<compile_context>
chip_gen: v6e
topology: v6e:2x2x1
jax: 0.10.0
libtpu: 0.0.40
codegen_flags: <defaults>
</compile_context>

<pallas_src>
import jax
import jax.numpy as jnp
from jax.experimental import pallas as pl
from jax.experimental.pallas import tpu as pltpu

INPUT_DIM = 512
HIDDEN1 = 512
HIDDEN2 = 256
OUTPUT_DIM = 256


def qnetwork_kernel(x_ref, w1_ref, b1_ref, w2_ref, b2_ref, w3_ref, b3_ref, o_ref):
    # Fused 3-layer MLP, everything resident in VMEM.
    # Matmuls in the weights' compute dtype (bf16 or f32) with f32 accumulation;
    # bias add + ReLU kept in f32.
    cdt = w1_ref.dtype
    x = x_ref[...].astype(cdt)

    h1 = jnp.dot(x, w1_ref[...], preferred_element_type=jnp.float32) + b1_ref[...]
    h1 = jnp.maximum(h1, 0.0).astype(cdt)

    h2 = jnp.dot(h1, w2_ref[...], preferred_element_type=jnp.float32) + b2_ref[...]
    h2 = jnp.maximum(h2, 0.0).astype(cdt)

    out = jnp.dot(h2, w3_ref[...], preferred_element_type=jnp.float32) + b3_ref[...]
    o_ref[...] = out.astype(o_ref.dtype)


def qnetwork_forward(x, params, *, tb=256, use_bf16=True):
    """x: (B, 512) float32. params: dict of w1,b1,w2,b2,w3,b3 (f32).

    tb: batch tile.  If B <= tb a single grid step covers the whole (sublane-
    padded) batch; otherwise the batch is zero-padded to a multiple of tb and
    tiled ("parallel" grid axis -> v7x megacore sharding).
    """
    B = x.shape[0]
    out_dtype = jnp.float32
    compute_dtype = jnp.bfloat16 if use_bf16 else jnp.float32

    # Weights in compute dtype (halves the one-time HBM->VMEM DMA with bf16);
    # biases stay f32 since they are added to the f32 accumulator.
    w1 = params["w1"].astype(compute_dtype)
    w2 = params["w2"].astype(compute_dtype)
    w3 = params["w3"].astype(compute_dtype)
    b1 = params["b1"].astype(jnp.float32)
    b2 = params["b2"].astype(jnp.float32)
    b3 = params["b3"].astype(jnp.float32)

    # Batch tiling: single step (padded to a multiple of 8 sublanes) for small
    # batches, padded tb-sized tiles otherwise.
    if B <= tb:
        b_pad = max(8, ((B + 7) // 8) * 8)
        tb_eff = b_pad
    else:
        tb_eff = tb
        b_pad = ((B + tb - 1) // tb) * tb

    x_in = x.astype(compute_dtype)
    if b_pad != B:
        x_in = jnp.pad(x_in, ((0, b_pad - B), (0, 0)))

    grid = (b_pad // tb_eff,)
    single = pl.Buffered(1)  # weights/biases: constant index_map -> no double buffer

    out = pl.pallas_call(
        qnetwork_kernel,
        out_shape=jax.ShapeDtypeStruct((b_pad, OUTPUT_DIM), out_dtype),
        grid_spec=pltpu.PrefetchScalarGridSpec(
            num_scalar_prefetch=0,
            grid=grid,
            in_specs=[
                pl.BlockSpec((tb_eff, INPUT_DIM), lambda i: (i, 0)),  # x tile (2-buf)
                pl.BlockSpec((INPUT_DIM, HIDDEN1), lambda i: (0, 0),
                             pipeline_mode=single),                   # w1
                pl.BlockSpec((1, HIDDEN1), lambda i: (0, 0),
                             pipeline_mode=single),                   # b1
                pl.BlockSpec((HIDDEN1, HIDDEN2), lambda i: (0, 0),
                             pipeline_mode=single),                   # w2
                pl.BlockSpec((1, HIDDEN2), lambda i: (0, 0),
                             pipeline_mode=single),                   # b2
                pl.BlockSpec((HIDDEN2, OUTPUT_DIM), lambda i: (0, 0),
                             pipeline_mode=single),                   # w3
                pl.BlockSpec((1, OUTPUT_DIM), lambda i: (0, 0),
                             pipeline_mode=single),                   # b3
            ],
            out_specs=pl.BlockSpec((tb_eff, OUTPUT_DIM), lambda i: (i, 0)),
        ),
        compiler_params=pltpu.CompilerParams(
            dimension_semantics=("parallel",),
        ),
    )(x_in, w1, b1, w2, b2, w3, b3)

    if b_pad != B:
        out = out[:B]
    return out


def init_params(key):
    """Deterministic synthetic init matching PyTorch Linear shapes/distribution."""
    ks = jax.random.split(key, 6)

    def lin(kw, kb, fan_in, fan_out):
        bound = 1.0 / jnp.sqrt(jnp.float32(fan_in))
        w = jax.random.uniform(kw, (fan_in, fan_out), jnp.float32, -bound, bound)
        b = jax.random.uniform(kb, (1, fan_out), jnp.float32, -bound, bound)
        return w, b

    w1, b1 = lin(ks[0], ks[1], INPUT_DIM, HIDDEN1)
    w2, b2 = lin(ks[2], ks[3], HIDDEN1, HIDDEN2)
    w3, b3 = lin(ks[4], ks[5], HIDDEN2, OUTPUT_DIM)
    return {"w1": w1, "b1": b1, "w2": w2, "b2": b2, "w3": w3, "b3": b3}


def reference_forward(x, p):
    h1 = jnp.maximum(x @ p["w1"] + p["b1"], 0.0)
    h2 = jnp.maximum(h1 @ p["w2"] + p["b2"], 0.0)
    return h2 @ p["w3"] + p["b3"]


if __name__ == "__main__":
    key = jax.random.PRNGKey(0)
    k_x, k_p, k_x2 = jax.random.split(key, 3)
    params = init_params(k_p)

    # --- small-batch path (single grid step, sublane-padded, whole batch resident) ---
    batch = 4
    x = jax.random.normal(k_x, (batch, INPUT_DIM), jnp.float32)
    ref = reference_forward(x, params)

    # f32 path: tight tolerance.
    out_f32 = jax.block_until_ready(qnetwork_forward(x, params, use_bf16=False))
    assert out_f32.shape == (batch, OUTPUT_DIM), out_f32.shape
    assert jnp.allclose(out_f32, ref, atol=1e-4, rtol=1e-4), "f32 mismatch vs reference"

    # bf16-matmul path (default): relaxed tolerance for bf16 inputs, f32 accumulation.
    out_bf16 = jax.block_until_ready(qnetwork_forward(x, params, use_bf16=True))
    assert jnp.allclose(out_bf16, ref, atol=3e-2, rtol=3e-2), "bf16 mismatch vs reference"

    # --- tiled path: non-multiple batch, exercises padding + multi-step grid ---
    batch2 = 300
    x2 = jax.random.normal(k_x2, (batch2, INPUT_DIM), jnp.float32)
    ref2 = reference_forward(x2, params)
    out2 = jax.block_until_ready(qnetwork_forward(x2, params, tb=128, use_bf16=True))
    assert out2.shape == (batch2, OUTPUT_DIM), out2.shape
    assert jnp.allclose(out2, ref2, atol=3e-2, rtol=3e-2), "tiled bf16 mismatch vs reference"

    print("KERNEL_OK")
</pallas_src>

<mosaic_0001>
module attributes {stable_mosaic.version = 11 : i64} {
  func.func @qnetwork_kernel(%arg0: i32, %arg1: memref<8x512xf32, #tpu.memory_space<vmem>>, %arg2: memref<512x512xf32, #tpu.memory_space<vmem>>, %arg3: memref<1x512xf32, #tpu.memory_space<vmem>>, %arg4: memref<512x256xf32, #tpu.memory_space<vmem>>, %arg5: memref<1x256xf32, #tpu.memory_space<vmem>>, %arg6: memref<256x256xf32, #tpu.memory_space<vmem>>, %arg7: memref<1x256xf32, #tpu.memory_space<vmem>>, %arg8: memref<8x256xf32, #tpu.memory_space<vmem>>) attributes {dimension_semantics = [#tpu.dimension_semantics<parallel>], iteration_bounds = array<i64: 1>, scalar_prefetch = 0 : i64, scratch_operands = 0 : i64, tpu.core_type = #tpu.core_type<tc>, window_params = [{transform_indices = @transform_0, window_bounds = array<i64: 8, 512>}, {pipeline_mode = #tpu.pipeline_mode<synchronous>, transform_indices = @transform_1, window_bounds = array<i64: 512, 512>}, {pipeline_mode = #tpu.pipeline_mode<synchronous>, transform_indices = @transform_2, window_bounds = array<i64: 1, 512>}, {pipeline_mode = #tpu.pipeline_mode<synchronous>, transform_indices = @transform_3, window_bounds = array<i64: 512, 256>}, {pipeline_mode = #tpu.pipeline_mode<synchronous>, transform_indices = @transform_4, window_bounds = array<i64: 1, 256>}, {pipeline_mode = #tpu.pipeline_mode<synchronous>, transform_indices = @transform_5, window_bounds = array<i64: 256, 256>}, {pipeline_mode = #tpu.pipeline_mode<synchronous>, transform_indices = @transform_6, window_bounds = array<i64: 1, 256>}, {transform_indices = @transform_7, window_bounds = array<i64: 8, 256>}]} {
    %c0 = arith.constant 0 : index
    %c0_0 = arith.constant 0 : index
    %0 = vector.load %arg1[%c0, %c0_0] : memref<8x512xf32, #tpu.memory_space<vmem>>, vector<8x512xf32>
    %c0_1 = arith.constant 0 : index
    %c0_2 = arith.constant 0 : index
    %1 = vector.load %arg2[%c0_1, %c0_2] : memref<512x512xf32, #tpu.memory_space<vmem>>, vector<512x512xf32>
    %cst = arith.constant dense<0.000000e+00> : vector<8x512xf32>
    %2 = tpu.matmul %0, %1, %cst {dimension_numbers = #tpu.dot_dimension_numbers<[1], [0], [0], [1], [0, 0, 1, 1], [], []>} : vector<8x512xf32>, vector<512x512xf32>, vector<8x512xf32> -> vector<8x512xf32>
    %c0_3 = arith.constant 0 : index
    %c0_4 = arith.constant 0 : index
    %3 = vector.load %arg3[%c0_3, %c0_4] : memref<1x512xf32, #tpu.memory_space<vmem>>, vector<1x512xf32>
    %4 = vector.broadcast %3 : vector<1x512xf32> to vector<8x512xf32>
    %5 = arith.addf %2, %4 : vector<8x512xf32>
    %cst_5 = arith.constant 0.000000e+00 : f32
    %6 = vector.broadcast %cst_5 : f32 to vector<8x512xf32>
    %7 = arith.maximumf %5, %6 : vector<8x512xf32>
    %c0_6 = arith.constant 0 : index
    %c0_7 = arith.constant 0 : index
    %8 = vector.load %arg4[%c0_6, %c0_7] : memref<512x256xf32, #tpu.memory_space<vmem>>, vector<512x256xf32>
    %cst_8 = arith.constant dense<0.000000e+00> : vector<8x256xf32>
    %9 = tpu.matmul %7, %8, %cst_8 {dimension_numbers = #tpu.dot_dimension_numbers<[1], [0], [0], [1], [0, 0, 1, 1], [], []>} : vector<8x512xf32>, vector<512x256xf32>, vector<8x256xf32> -> vector<8x256xf32>
    %c0_9 = arith.constant 0 : index
    %c0_10 = arith.constant 0 : index
    %10 = vector.load %arg5[%c0_9, %c0_10] : memref<1x256xf32, #tpu.memory_space<vmem>>, vector<1x256xf32>
    %11 = vector.broadcast %10 : vector<1x256xf32> to vector<8x256xf32>
    %12 = arith.addf %9, %11 : vector<8x256xf32>
    %cst_11 = arith.constant 0.000000e+00 : f32
    %13 = vector.broadcast %cst_11 : f32 to vector<8x256xf32>
    %14 = arith.maximumf %12, %13 : vector<8x256xf32>
    %c0_12 = arith.constant 0 : index
    %c0_13 = arith.constant 0 : index
    %15 = vector.load %arg6[%c0_12, %c0_13] : memref<256x256xf32, #tpu.memory_space<vmem>>, vector<256x256xf32>
    %cst_14 = arith.constant dense<0.000000e+00> : vector<8x256xf32>
    %16 = tpu.matmul %14, %15, %cst_14 {dimension_numbers = #tpu.dot_dimension_numbers<[1], [0], [0], [1], [0, 0, 1, 1], [], []>} : vector<8x256xf32>, vector<256x256xf32>, vector<8x256xf32> -> vector<8x256xf32>
    %c0_15 = arith.constant 0 : index
    %c0_16 = arith.constant 0 : index
    %17 = vector.load %arg7[%c0_15, %c0_16] : memref<1x256xf32, #tpu.memory_space<vmem>>, vector<1x256xf32>
    %18 = vector.broadcast %17 : vector<1x256xf32> to vector<8x256xf32>
    %19 = arith.addf %16, %18 : vector<8x256xf32>
    %c0_17 = arith.constant 0 : index
    %c0_18 = arith.constant 0 : index
    %20 = vector.load %arg8[%c0_17, %c0_18] : memref<8x256xf32, #tpu.memory_space<vmem>>, vector<8x256xf32>
    tpu.vector_store %arg8[%c0_17, %c0_18], %19 {strides = array<i32>} : memref<8x256xf32, #tpu.memory_space<vmem>>, vector<8x256xf32>,
    return
  }
  func.func @transform_0(%arg0: i32) -> (i32, i32) {
    %c0_i32 = arith.constant 0 : i32
    %c0_i32_0 = arith.constant 0 : i32
    return %arg0, %c0_i32 : i32, i32
  }
  func.func @transform_1(%arg0: i32) -> (i32, i32) {
    %c0_i32 = arith.constant 0 : i32
    %c0_i32_0 = arith.constant 0 : i32
    %c0_i32_1 = arith.constant 0 : i32
    return %c0_i32, %c0_i32_0 : i32, i32
  }
  func.func @transform_2(%arg0: i32) -> (i32, i32) {
    %c0_i32 = arith.constant 0 : i32
    %c0_i32_0 = arith.constant 0 : i32
    %c0_i32_1 = arith.constant 0 : i32
    return %c0_i32, %c0_i32_0 : i32, i32
  }
  func.func @transform_3(%arg0: i32) -> (i32, i32) {
    %c0_i32 = arith.constant 0 : i32
    %c0_i32_0 = arith.constant 0 : i32
    %c0_i32_1 = arith.constant 0 : i32
    return %c0_i32, %c0_i32_0 : i32, i32
  }
  func.func @transform_4(%arg0: i32) -> (i32, i32) {
    %c0_i32 = arith.constant 0 : i32
    %c0_i32_0 = arith.constant 0 : i32
    %c0_i32_1 = arith.constant 0 : i32
    return %c0_i32, %c0_i32_0 : i32, i32
  }
  func.func @transform_5(%arg0: i32) -> (i32, i32) {
    %c0_i32 = arith.constant 0 : i32
    %c0_i32_0 = arith.constant 0 : i32
    %c0_i32_1 = arith.constant 0 : i32
    return %c0_i32, %c0_i32_0 : i32, i32
  }
  func.func @transform_6(%arg0: i32) -> (i32, i32) {
    %c0_i32 = arith.constant 0 : i32
    %c0_i32_0 = arith.constant 0 : i32
    %c0_i32_1 = arith.constant 0 : i32
    return %c0_i32, %c0_i32_0 : i32, i32
  }
  func.func @transform_7(%arg0: i32) -> (i32, i32) {
    %c0_i32 = arith.constant 0 : i32
    %c0_i32_0 = arith.constant 0 : i32
    return %arg0, %c0_i32 : i32, i32
  }
}

</mosaic_0001>

<bundles_post_ra>
// kernel: tpu_custom_call.1
= control target key start
LH: loop header
LB: loop body
LE: loop exit
PB: predicated region body
PF: predicated region fallthrough
CT: control target
= control target key end

     0   :  { %12 = vsyncpa [#allocation3], 0  ;;  %s1355_s0 = inlined_call_operand.hbm [shape: f32[8,512], index: 0, kind: input, shape index: {}]   ;;  %s1356_s1 = inlined_call_operand.hbm [shape: f32[512,512], index: 1, kind: input, shape index: {}]   ;;  %s1357_s2 = inlined_call_operand.hbm [shape: f32[1,512], index: 2, kind: input, shape index: {}]   ;;  %s1358_s3 = inlined_call_operand.hbm [shape: f32[512,256], index: 3, kind: input, shape index: {}]   ;;  %s1359_s4 = inlined_call_operand.vmem [shape: f32[1,256], index: 4, kind: input, shape index: {}]   ;;  %s1360_s5 = inlined_call_operand.hbm [shape: f32[256,256], index: 5, kind: input, shape index: {}]   ;;  %s1361_s6 = inlined_call_operand.vmem [shape: f32[1,256], index: 6, kind: input, shape index: {}]   ;;  %s1362_s7 = inlined_call_operand.hbm [shape: f32[8,256], index: 7, kind: output, shape index: {}]  }
   0x1   :  { %13 = vsyncpa [#allocation6], 0 }
   0x2   :  { %14 = vsyncpa [#allocation9], 0 }
   0x3   :  { %15 = vsyncpa [#allocation4], 0  ;;  %s1249_s24 = smov [#allocation5]  }
   0x4   :  { %s31_s25 = sshll.u32 %s1249_s24, 4  ;;  %s32_s25 = int_to_ptr.vmem [resolvable:$true] %s31_s25 }
   0x5   :  { %s1129_s26 = scalar_lea.vmem %s32_s25, 32768  ;;  %p1134_p1 = scmp.lt.s32.totalorder %s32_s25, %s32_s25 }
   0x6   :  { %p1130_p0 = scmp.ne.s32.totalorder %s32_s25, %s1129_s26  ;;  %p1135_p2 = scmp.lt.s32.totalorder %s1129_s26, %s1129_s26 }
   0x8   :  { %p1136_p3 = por %p1135_p2, %p1134_p1 }
   0xa   :  { %p1137_p4 = pnand %p1136_p3, %p1130_p0 }
   0xc   :  { %1140 = shalt.err (!%p1137_p4)
}
   0xd   :  { %s1250_s27 = smov 512   ;;  %s1251_s28 = smov 32  }
   0xe   :  { %37 = dma.hbm_to_vmem [thread:$0]  %s1356_s1, 32768, %s32_s25, [#allocation6], %s1250_s27, %s1250_s27, %s1251_s28  }
   0xf   :  { %s1252_s8 = smov [#allocation8]  }
  0x10   :  { %s53_s9 = sshll.u32 %s1252_s8, 4  ;;  %s54_s9 = int_to_ptr.vmem [resolvable:$true] %s53_s9 }
  0x11   :  { %s1149_s10 = scalar_lea.vmem %s54_s9, 16384  ;;  %p1154_p6 = scmp.lt.s32.totalorder %s54_s9, %s54_s9 }
  0x12   :  { %p1150_p5 = scmp.ne.s32.totalorder %s54_s9, %s1149_s10  ;;  %p1155_p7 = scmp.lt.s32.totalorder %s1149_s10, %s1149_s10 }
  0x14   :  { %p1156_p8 = por %p1155_p7, %p1154_p6 }
  0x16   :  { %p1157_p9 = pnand %p1156_p8, %p1150_p5 }
  0x18   :  { %1160 = shalt.err (!%p1157_p9)
}
  0x19   :  { %s1253_s11 = smov 256   ;;  %s1254_s12 = smov 16  }
  0x1a   :  { %59 = dma.hbm_to_vmem [thread:$0]  %s1358_s3, 16384, %s54_s9, [#allocation9], %s1253_s11, %s1253_s11, %s1254_s12  }
  0x1b   :  { %s1255_s1 = smov [#allocation2]   ;;  %s1256_s16 = smov [#allocation7]  }
  0x1c   :  { %s22_s15 = sshll.u32 %s1255_s1, 4  ;;  %s44_s17 = sshll.u32 %s1256_s16, 4  ;;  %s23_s15 = int_to_ptr.vmem [resolvable:$true] %s22_s15  ;;  %s45_s17 = int_to_ptr.vmem [resolvable:$true] %s44_s17 }
  0x1d   :  { %s1169_s18 = scalar_lea.vmem %s23_s15, 512  ;;  %p1174_p11 = scmp.lt.s32.totalorder %s23_s15, %s23_s15 }
  0x1e   :  { %p1170_p10 = scmp.ne.s32.totalorder %s23_s15, %s1169_s18  ;;  %p1175_p12 = scmp.lt.s32.totalorder %s1169_s18, %s1169_s18 }
  0x20   :  { %p1176_p13 = por %p1175_p12, %p1174_p11 }
  0x22   :  { %p1177_p0 = pnand %p1176_p13, %p1170_p10 }
  0x24   :  { %1180 = shalt.err (!%p1177_p0)
}
  0x25   :  { %25 = dma.hbm_to_vmem [thread:$0]  %s1355_s0, 512, %s23_s15, [#allocation3]  }
  0x26   :  { %s1189_s21 = scalar_lea.vmem %s45_s17, 64  ;;  %p1194_p2 = scmp.lt.s32.totalorder %s45_s17, %s45_s17 }
  0x27   :  { %p1190_p1 = scmp.ne.s32.totalorder %s45_s17, %s1189_s21  ;;  %p1195_p3 = scmp.lt.s32.totalorder %s1189_s21, %s1189_s21 }
  0x29   :  { %p1196_p4 = por %p1195_p3, %p1194_p2 }
  0x2b   :  { %p1197_p5 = pnand %p1196_p4, %p1190_p1 }
  0x2d   :  { %1200 = shalt.err (!%p1197_p5)
}
  0x2e   :  { %47 = dma.hbm_to_vmem [thread:$0]  %s1357_s2, 64, %s45_s17, [#allocation6]  }
  0x2f   :  { %s1257_s23 = smov [#allocation10]  }
  0x30   :  { %s67_s24 = sshll.u32 %s1257_s23, 4  ;;  %s68_s24 = int_to_ptr.vmem [resolvable:$true] %s67_s24 }
  0x31   :  { %s1209_s25 = scalar_lea.vmem %s68_s24, 8192  ;;  %p1214_p7 = scmp.lt.s32.totalorder %s68_s24, %s68_s24 }
  0x32   :  { %p1210_p6 = scmp.ne.s32.totalorder %s68_s24, %s1209_s25  ;;  %p1215_p8 = scmp.lt.s32.totalorder %s1209_s25, %s1209_s25 }
  0x34   :  { %p1216_p9 = por %p1215_p8, %p1214_p7 }
  0x36   :  { %p1217_p10 = pnand %p1216_p9, %p1210_p6 }
  0x38   :  { %1220 = shalt.err (!%p1217_p10)
}
  0x39   :  { %73 = dma.hbm_to_vmem [thread:$0]  %s1360_s5, 8192, %s68_s24, [#allocation9], %s1253_s11, %s1253_s11, %s1254_s12  }
  0x3a   :  { %1241 = dma.done.wait [#allocation3], 512  }
  0x3b   :  { %1242 = vsyncadd [#allocation3], 4294966784 }
  0x3c   :  { %1243 = dma.done.wait [#allocation6], 32832  }
  0x3d   :  { %1244 = vsyncadd [#allocation6], 4294934464 }
  0x3e   :  { %1245 = dma.done.wait [#allocation9], 24576  }
  0x3f   :  { %1246 = vsyncadd [#allocation9], 4294942720  ;;  %v156_v0 = vld [vmem:[#allocation5 + $0x1e8] sm:$0xff]  ;;  %v155_v2 = vld [vmem:[#allocation5 + $0x1e0] sm:$0xff] }
  0x40   :  { %v284_v1 = vld [vmem:[#allocation5 + $0x5e8] sm:$0xff]  ;;  %373 = vmatprep.subr.mxu0 %v156_v0  ;;  %v283_v3 = vld [vmem:[#allocation5 + $0x5e0] sm:$0xff] }
  0x41   :  { %444 = vmatprep.subr.mxu1 %v284_v1  ;;  %v152_v4 = vld [vmem:[#allocation5 + $0x1c8] sm:$0xff]  ;;  %374 = vmatpush1.msra.mxu0 %v155_v2  ;;  %v151_v6 = vld [vmem:[#allocation5 + $0x1c0] sm:$0xff] }
  0x42   :  { %v280_v5 = vld [vmem:[#allocation5 + $0x5c8] sm:$0xff]  ;;  %445 = vmatpush1.msra.mxu1 %v283_v3  ;;  %v279_v7 = vld [vmem:[#allocation5 + $0x5c0] sm:$0xff]  ;;  %375 = vmatprep.subr.mxu0 %v152_v4 }
  0x43   :  { %v148_v8 = vld [vmem:[#allocation5 + $0x1a8] sm:$0xff]  ;;  %446 = vmatprep.subr.mxu1 %v280_v5  ;;  %v147_v10 = vld [vmem:[#allocation5 + $0x1a0] sm:$0xff]  ;;  %376 = vmatpush1.msra.mxu0 %v151_v6 }
  0x44   :  { %v276_v9 = vld [vmem:[#allocation5 + $0x5a8] sm:$0xff]  ;;  %v275_v11 = vld [vmem:[#allocation5 + $0x5a0] sm:$0xff]  ;;  %447 = vmatpush1.msra.mxu1 %v279_v7  ;;  %377 = vmatprep.subr.mxu0 %v148_v8 }
  0x45   :  { %v144_v12 = vld [vmem:[#allocation5 + $0x188] sm:$0xff]  ;;  %448 = vmatprep.subr.mxu1 %v276_v9  ;;  %v143_v14 = vld [vmem:[#allocation5 + $0x180] sm:$0xff]  ;;  %378 = vmatpush1.msra.mxu0 %v147_v10 }
  0x46   :  { %v272_v13 = vld [vmem:[#allocation5 + $0x588] sm:$0xff]  ;;  %v271_v15 = vld [vmem:[#allocation5 + $0x580] sm:$0xff]  ;;  %449 = vmatpush1.msra.mxu1 %v275_v11  ;;  %379 = vmatprep.subr.mxu0 %v144_v12 }
  0x47   :  { %v140_v16 = vld [vmem:[#allocation5 + $0x168] sm:$0xff]  ;;  %450 = vmatprep.subr.mxu1 %v272_v13  ;;  %v139_v18 = vld [vmem:[#allocation5 + $0x160] sm:$0xff]  ;;  %380 = vmatpush1.msra.mxu0 %v143_v14 }
  0x48   :  { %v268_v17 = vld [vmem:[#allocation5 + $0x568] sm:$0xff]  ;;  %v267_v19 = vld [vmem:[#allocation5 + $0x560] sm:$0xff]  ;;  %451 = vmatpush1.msra.mxu1 %v271_v15  ;;  %381 = vmatprep.subr.mxu0 %v140_v16 }
  0x49   :  { %v136_v20 = vld [vmem:[#allocation5 + $0x148] sm:$0xff]  ;;  %452 = vmatprep.subr.mxu1 %v268_v17  ;;  %v135_v22 = vld [vmem:[#allocation5 + $0x140] sm:$0xff]  ;;  %382 = vmatpush1.msra.mxu0 %v139_v18 }
  0x4a   :  { %v264_v21 = vld [vmem:[#allocation5 + $0x548] sm:$0xff]  ;;  %v263_v23 = vld [vmem:[#allocation5 + $0x540] sm:$0xff]  ;;  %453 = vmatpush1.msra.mxu1 %v267_v19  ;;  %383 = vmatprep.subr.mxu0 %v136_v20 }
  0x4b   :  { %v132_v24 = vld [vmem:[#allocation5 + $0x128] sm:$0xff]  ;;  %454 = vmatprep.subr.mxu1 %v264_v21  ;;  %v131_v26 = vld [vmem:[#allocation5 + $0x120] sm:$0xff]  ;;  %384 = vmatpush1.msra.mxu0 %v135_v22 }
  0x4c   :  { %v260_v25 = vld [vmem:[#allocation5 + $0x528] sm:$0xff]  ;;  %v259_v27 = vld [vmem:[#allocation5 + $0x520] sm:$0xff]  ;;  %455 = vmatpush1.msra.mxu1 %v263_v23  ;;  %385 = vmatprep.subr.mxu0 %v132_v24 }
  0x4d   :  { %v128_v28 = vld [vmem:[#allocation5 + $0x108] sm:$0xff]  ;;  %456 = vmatprep.subr.mxu1 %v260_v25  ;;  %v127_v30 = vld [vmem:[#allocation5 + $0x100] sm:$0xff]  ;;  %386 = vmatpush1.msra.mxu0 %v131_v26 }
  0x4e   :  { %v256_v29 = vld [vmem:[#allocation5 + $0x508] sm:$0xff]  ;;  %v255_v31 = vld [vmem:[#allocation5 + $0x500] sm:$0xff]  ;;  %457 = vmatpush1.msra.mxu1 %v259_v27  ;;  %387 = vmatprep.subr.mxu0 %v128_v28 }
  0x4f   :  { %v124_v32 = vld [vmem:[#allocation5 + $0xe8] sm:$0xff]  ;;  %458 = vmatprep.subr.mxu1 %v256_v29  ;;  %v123_v34 = vld [vmem:[#allocation5 + $0xe0] sm:$0xff]  ;;  %388 = vmatpush1.msra.mxu0 %v127_v30 }
  0x50   :  { %v252_v33 = vld [vmem:[#allocation5 + $0x4e8] sm:$0xff]  ;;  %v251_v35 = vld [vmem:[#allocation5 + $0x4e0] sm:$0xff]  ;;  %459 = vmatpush1.msra.mxu1 %v255_v31  ;;  %389 = vmatprep.subr.mxu0 %v124_v32 }
  0x51   :  { %v120_v36 = vld [vmem:[#allocation5 + $0xc8] sm:$0xff]  ;;  %460 = vmatprep.subr.mxu1 %v252_v33  ;;  %v119_v38 = vld [vmem:[#allocation5 + $0xc0] sm:$0xff]  ;;  %390 = vmatpush1.msra.mxu0 %v123_v34 }
  0x52   :  { %v248_v37 = vld [vmem:[#allocation5 + $0x4c8] sm:$0xff]  ;;  %v247_v39 = vld [vmem:[#allocation5 + $0x4c0] sm:$0xff]  ;;  %461 = vmatpush1.msra.mxu1 %v251_v35  ;;  %391 = vmatprep.subr.mxu0 %v120_v36 }
  0x53   :  { %v116_v40 = vld [vmem:[#allocation5 + $0xa8] sm:$0xff]  ;;  %462 = vmatprep.subr.mxu1 %v248_v37  ;;  %v115_v42 = vld [vmem:[#allocation5 + $0xa0] sm:$0xff]  ;;  %392 = vmatpush1.msra.mxu0 %v119_v38 }
  0x54   :  { %v244_v41 = vld [vmem:[#allocation5 + $0x4a8] sm:$0xff]  ;;  %v243_v43 = vld [vmem:[#allocation5 + $0x4a0] sm:$0xff]  ;;  %463 = vmatpush1.msra.mxu1 %v247_v39  ;;  %393 = vmatprep.subr.mxu0 %v116_v40 }
  0x55   :  { %v112_v44 = vld [vmem:[#allocation5 + $0x88] sm:$0xff]  ;;  %464 = vmatprep.subr.mxu1 %v244_v41  ;;  %v111_v46 = vld [vmem:[#allocation5 + $0x80] sm:$0xff]  ;;  %394 = vmatpush1.msra.mxu0 %v115_v42 }
  0x56   :  { %v240_v45 = vld [vmem:[#allocation5 + $0x488] sm:$0xff]  ;;  %v239_v47 = vld [vmem:[#allocation5 + $0x480] sm:$0xff]  ;;  %465 = vmatpush1.msra.mxu1 %v243_v43  ;;  %395 = vmatprep.subr.mxu0 %v112_v44 }
  0x57   :  { %v108_v48 = vld [vmem:[#allocation5 + $0x68] sm:$0xff]  ;;  %466 = vmatprep.subr.mxu1 %v240_v45  ;;  %v107_v50 = vld [vmem:[#allocation5 + $0x60] sm:$0xff]  ;;  %396 = vmatpush1.msra.mxu0 %v111_v46 }
  0x58   :  { %v236_v49 = vld [vmem:[#allocation5 + $0x468] sm:$0xff]  ;;  %v235_v51 = vld [vmem:[#allocation5 + $0x460] sm:$0xff]  ;;  %467 = vmatpush1.msra.mxu1 %v239_v47  ;;  %397 = vmatprep.subr.mxu0 %v108_v48 }
  0x59   :  { %v104_v52 = vld [vmem:[#allocation5 + $0x48] sm:$0xff]  ;;  %468 = vmatprep.subr.mxu1 %v236_v49  ;;  %v103_v54 = vld [vmem:[#allocation5 + $0x40] sm:$0xff]  ;;  %398 = vmatpush1.msra.mxu0 %v107_v50 }
  0x5a   :  { %v232_v53 = vld [vmem:[#allocation5 + $0x448] sm:$0xff]  ;;  %v231_v55 = vld [vmem:[#allocation5 + $0x440] sm:$0xff]  ;;  %469 = vmatpush1.msra.mxu1 %v235_v51  ;;  %399 = vmatprep.subr.mxu0 %v104_v52 }
  0x5b   :  { %v100_v56 = vld [vmem:[#allocation5 + $0x28] sm:$0xff]  ;;  %470 = vmatprep.subr.mxu1 %v232_v53  ;;  %v99_v58 = vld [vmem:[#allocation5 + $0x20] sm:$0xff]  ;;  %400 = vmatpush1.msra.mxu0 %v103_v54 }
  0x5c   :  { %v228_v57 = vld [vmem:[#allocation5 + $0x428] sm:$0xff]  ;;  %v227_v59 = vld [vmem:[#allocation5 + $0x420] sm:$0xff]  ;;  %471 = vmatpush1.msra.mxu1 %v231_v55  ;;  %401 = vmatprep.subr.mxu0 %v100_v56 }
  0x5d   :  { %v96_v60 = vld [vmem:[#allocation5 + $0x8] sm:$0xff]  ;;  %472 = vmatprep.subr.mxu1 %v228_v57  ;;  %v95_v62 = vld [vmem:[#allocation5] sm:$0xff]  ;;  %402 = vmatpush1.msra.mxu0 %v99_v58 }
  0x5e   :  { %v224_v61 = vld [vmem:[#allocation5 + $0x408] sm:$0xff]  ;;  %v223_v63 = vld [vmem:[#allocation5 + $0x400] sm:$0xff]  ;;  %473 = vmatpush1.msra.mxu1 %v227_v59  ;;  %403 = vmatprep.subr.mxu0 %v96_v60 }
  0x5f   :  { %v220_v0 = vld [vmem:[#allocation5 + $0x3e8] sm:$0xff]  ;;  %474 = vmatprep.subr.mxu1 %v224_v61  ;;  %v219_v2 = vld [vmem:[#allocation5 + $0x3e0] sm:$0xff]  ;;  %404 = vmatpush1.msra.mxu0 %v95_v62 }
  0x60   :  { %v348_v1 = vld [vmem:[#allocation5 + $0x7e8] sm:$0xff]  ;;  %v347_v3 = vld [vmem:[#allocation5 + $0x7e0] sm:$0xff]  ;;  %475 = vmatpush1.msra.mxu1 %v223_v63  ;;  %405 = vmatprep.subr.mxu0 %v220_v0 }
  0x61   :  { %v216_v4 = vld [vmem:[#allocation5 + $0x3c8] sm:$0xff]  ;;  %476 = vmatprep.subr.mxu1 %v348_v1  ;;  %v215_v6 = vld [vmem:[#allocation5 + $0x3c0] sm:$0xff]  ;;  %406 = vmatpush2.msra.mxu0 %v219_v2  ;;  %v1324_v2 = vld [vmem:[#allocation2 + $0x18] sm:$0xff] }
  0x62   :  { %v344_v5 = vld [vmem:[#allocation5 + $0x7c8] sm:$0xff]  ;;  %v343_v7 = vld [vmem:[#allocation5 + $0x7c0] sm:$0xff]  ;;  %477 = vmatpush2.msra.mxu1 %v347_v3  ;;  %407 = vmatprep.subr.mxu0 %v216_v4  ;;  %v158_v3 = vld [vmem:[#allocation5 + $0x1f8] sm:$0xff] }
  0x63   :  { %v212_v8 = vld [vmem:[#allocation5 + $0x3a8] sm:$0xff]  ;;  %478 = vmatprep.subr.mxu1 %v344_v5  ;;  %v211_v10 = vld [vmem:[#allocation5 + $0x3a0] sm:$0xff]  ;;  %408 = vmatpush2.msra.mxu0 %v215_v6  ;;  %v286_v4 = vld [vmem:[#allocation5 + $0x5f8] sm:$0xff] }
  0x64   :  { %v340_v9 = vld [vmem:[#allocation5 + $0x7a8] sm:$0xff]  ;;  %v339_v11 = vld [vmem:[#allocation5 + $0x7a0] sm:$0xff]  ;;  %479 = vmatpush2.msra.mxu1 %v343_v7  ;;  %409 = vmatprep.subr.mxu0 %v212_v8  ;;  %v1327_v5 = vld [vmem:[#allocation2 + $0x10] sm:$0xff] }
  0x65   :  { %v208_v12 = vld [vmem:[#allocation5 + $0x388] sm:$0xff]  ;;  %480 = vmatprep.subr.mxu1 %v340_v9  ;;  %v207_v14 = vld [vmem:[#allocation5 + $0x380] sm:$0xff]  ;;  %410 = vmatpush2.msra.mxu0 %v211_v10  ;;  %v157_v6 = vld [vmem:[#allocation5 + $0x1f0] sm:$0xff] }
  0x66   :  { %v336_v13 = vld [vmem:[#allocation5 + $0x788] sm:$0xff]  ;;  %v335_v15 = vld [vmem:[#allocation5 + $0x780] sm:$0xff]  ;;  %481 = vmatpush2.msra.mxu1 %v339_v11  ;;  %411 = vmatprep.subr.mxu0 %v208_v12  ;;  %v285_v7 = vld [vmem:[#allocation5 + $0x5f0] sm:$0xff] }
  0x67   :  { %v204_v16 = vld [vmem:[#allocation5 + $0x368] sm:$0xff]  ;;  %482 = vmatprep.subr.mxu1 %v336_v13  ;;  %v203_v18 = vld [vmem:[#allocation5 + $0x360] sm:$0xff]  ;;  %412 = vmatpush2.msra.mxu0 %v207_v14  ;;  %v154_v8 = vld [vmem:[#allocation5 + $0x1d8] sm:$0xff] }
  0x68   :  { %v332_v17 = vld [vmem:[#allocation5 + $0x768] sm:$0xff]  ;;  %v331_v19 = vld [vmem:[#allocation5 + $0x760] sm:$0xff]  ;;  %483 = vmatpush2.msra.mxu1 %v335_v15  ;;  %413 = vmatprep.subr.mxu0 %v204_v16  ;;  %v282_v9 = vld [vmem:[#allocation5 + $0x5d8] sm:$0xff] }
  0x69   :  { %v200_v20 = vld [vmem:[#allocation5 + $0x348] sm:$0xff]  ;;  %484 = vmatprep.subr.mxu1 %v332_v17  ;;  %v199_v22 = vld [vmem:[#allocation5 + $0x340] sm:$0xff]  ;;  %414 = vmatpush2.msra.mxu0 %v203_v18  ;;  %v153_v10 = vld [vmem:[#allocation5 + $0x1d0] sm:$0xff] }
  0x6a   :  { %v328_v21 = vld [vmem:[#allocation5 + $0x748] sm:$0xff]  ;;  %v327_v23 = vld [vmem:[#allocation5 + $0x740] sm:$0xff]  ;;  %485 = vmatpush2.msra.mxu1 %v331_v19  ;;  %415 = vmatprep.subr.mxu0 %v200_v20  ;;  %v281_v11 = vld [vmem:[#allocation5 + $0x5d0] sm:$0xff] }
  0x6b   :  { %v196_v24 = vld [vmem:[#allocation5 + $0x328] sm:$0xff]  ;;  %486 = vmatprep.subr.mxu1 %v328_v21  ;;  %v195_v26 = vld [vmem:[#allocation5 + $0x320] sm:$0xff]  ;;  %416 = vmatpush2.msra.mxu0 %v199_v22  ;;  %v150_v12 = vld [vmem:[#allocation5 + $0x1b8] sm:$0xff] }
  0x6c   :  { %v324_v25 = vld [vmem:[#allocation5 + $0x728] sm:$0xff]  ;;  %v323_v27 = vld [vmem:[#allocation5 + $0x720] sm:$0xff]  ;;  %487 = vmatpush2.msra.mxu1 %v327_v23  ;;  %417 = vmatprep.subr.mxu0 %v196_v24  ;;  %v278_v13 = vld [vmem:[#allocation5 + $0x5b8] sm:$0xff] }
  0x6d   :  { %v192_v28 = vld [vmem:[#allocation5 + $0x308] sm:$0xff]  ;;  %488 = vmatprep.subr.mxu1 %v324_v25  ;;  %v191_v30 = vld [vmem:[#allocation5 + $0x300] sm:$0xff]  ;;  %418 = vmatpush2.msra.mxu0 %v195_v26  ;;  %v149_v14 = vld [vmem:[#allocation5 + $0x1b0] sm:$0xff] }
  0x6e   :  { %v320_v29 = vld [vmem:[#allocation5 + $0x708] sm:$0xff]  ;;  %v319_v31 = vld [vmem:[#allocation5 + $0x700] sm:$0xff]  ;;  %489 = vmatpush2.msra.mxu1 %v323_v27  ;;  %419 = vmatprep.subr.mxu0 %v192_v28  ;;  %v277_v15 = vld [vmem:[#allocation5 + $0x5b0] sm:$0xff] }
  0x6f   :  { %v188_v32 = vld [vmem:[#allocation5 + $0x2e8] sm:$0xff]  ;;  %490 = vmatprep.subr.mxu1 %v320_v29  ;;  %v187_v34 = vld [vmem:[#allocation5 + $0x2e0] sm:$0xff]  ;;  %420 = vmatpush2.msra.mxu0 %v191_v30  ;;  %v146_v16 = vld [vmem:[#allocation5 + $0x198] sm:$0xff] }
  0x70   :  { %v316_v33 = vld [vmem:[#allocation5 + $0x6e8] sm:$0xff]  ;;  %v315_v35 = vld [vmem:[#allocation5 + $0x6e0] sm:$0xff]  ;;  %491 = vmatpush2.msra.mxu1 %v319_v31  ;;  %421 = vmatprep.subr.mxu0 %v188_v32  ;;  %v274_v17 = vld [vmem:[#allocation5 + $0x598] sm:$0xff] }
  0x71   :  { %v184_v36 = vld [vmem:[#allocation5 + $0x2c8] sm:$0xff]  ;;  %492 = vmatprep.subr.mxu1 %v316_v33  ;;  %v183_v38 = vld [vmem:[#allocation5 + $0x2c0] sm:$0xff]  ;;  %422 = vmatpush2.msra.mxu0 %v187_v34  ;;  %v145_v18 = vld [vmem:[#allocation5 + $0x190] sm:$0xff] }
  0x72   :  { %v312_v37 = vld [vmem:[#allocation5 + $0x6c8] sm:$0xff]  ;;  %v311_v39 = vld [vmem:[#allocation5 + $0x6c0] sm:$0xff]  ;;  %493 = vmatpush2.msra.mxu1 %v315_v35  ;;  %423 = vmatprep.subr.mxu0 %v184_v36  ;;  %v273_v19 = vld [vmem:[#allocation5 + $0x590] sm:$0xff] }
  0x73   :  { %v180_v40 = vld [vmem:[#allocation5 + $0x2a8] sm:$0xff]  ;;  %494 = vmatprep.subr.mxu1 %v312_v37  ;;  %v179_v42 = vld [vmem:[#allocation5 + $0x2a0] sm:$0xff]  ;;  %424 = vmatpush2.msra.mxu0 %v183_v38  ;;  %v142_v20 = vld [vmem:[#allocation5 + $0x178] sm:$0xff] }
  0x74   :  { %v308_v41 = vld [vmem:[#allocation5 + $0x6a8] sm:$0xff]  ;;  %v307_v43 = vld [vmem:[#allocation5 + $0x6a0] sm:$0xff]  ;;  %495 = vmatpush2.msra.mxu1 %v311_v39  ;;  %425 = vmatprep.subr.mxu0 %v180_v40  ;;  %v270_v21 = vld [vmem:[#allocation5 + $0x578] sm:$0xff] }
  0x75   :  { %v176_v44 = vld [vmem:[#allocation5 + $0x288] sm:$0xff]  ;;  %496 = vmatprep.subr.mxu1 %v308_v41  ;;  %v175_v46 = vld [vmem:[#allocation5 + $0x280] sm:$0xff]  ;;  %426 = vmatpush2.msra.mxu0 %v179_v42  ;;  %v141_v22 = vld [vmem:[#allocation5 + $0x170] sm:$0xff] }
  0x76   :  { %v304_v45 = vld [vmem:[#allocation5 + $0x688] sm:$0xff]  ;;  %v303_v47 = vld [vmem:[#allocation5 + $0x680] sm:$0xff]  ;;  %497 = vmatpush2.msra.mxu1 %v307_v43  ;;  %427 = vmatprep.subr.mxu0 %v176_v44  ;;  %v269_v23 = vld [vmem:[#allocation5 + $0x570] sm:$0xff] }
  0x77   :  { %v172_v48 = vld [vmem:[#allocation5 + $0x268] sm:$0xff]  ;;  %498 = vmatprep.subr.mxu1 %v304_v45  ;;  %v171_v50 = vld [vmem:[#allocation5 + $0x260] sm:$0xff]  ;;  %428 = vmatpush2.msra.mxu0 %v175_v46  ;;  %v138_v24 = vld [vmem:[#allocation5 + $0x158] sm:$0xff] }
  0x78   :  { %v300_v49 = vld [vmem:[#allocation5 + $0x668] sm:$0xff]  ;;  %v299_v51 = vld [vmem:[#allocation5 + $0x660] sm:$0xff]  ;;  %499 = vmatpush2.msra.mxu1 %v303_v47  ;;  %429 = vmatprep.subr.mxu0 %v172_v48  ;;  %v266_v25 = vld [vmem:[#allocation5 + $0x558] sm:$0xff] }
  0x79   :  { %v168_v52 = vld [vmem:[#allocation5 + $0x248] sm:$0xff]  ;;  %500 = vmatprep.subr.mxu1 %v300_v49  ;;  %v167_v54 = vld [vmem:[#allocation5 + $0x240] sm:$0xff]  ;;  %430 = vmatpush2.msra.mxu0 %v171_v50  ;;  %v137_v26 = vld [vmem:[#allocation5 + $0x150] sm:$0xff] }
  0x7a   :  { %v296_v53 = vld [vmem:[#allocation5 + $0x648] sm:$0xff]  ;;  %v295_v55 = vld [vmem:[#allocation5 + $0x640] sm:$0xff]  ;;  %501 = vmatpush2.msra.mxu1 %v299_v51  ;;  %431 = vmatprep.subr.mxu0 %v168_v52  ;;  %v265_v27 = vld [vmem:[#allocation5 + $0x550] sm:$0xff] }
  0x7b   :  { %v164_v56 = vld [vmem:[#allocation5 + $0x228] sm:$0xff]  ;;  %502 = vmatprep.subr.mxu1 %v296_v53  ;;  %v163_v58 = vld [vmem:[#allocation5 + $0x220] sm:$0xff]  ;;  %432 = vmatpush2.msra.mxu0 %v167_v54  ;;  %v134_v28 = vld [vmem:[#allocation5 + $0x138] sm:$0xff] }
  0x7c   :  { %v292_v57 = vld [vmem:[#allocation5 + $0x628] sm:$0xff]  ;;  %v291_v59 = vld [vmem:[#allocation5 + $0x620] sm:$0xff]  ;;  %503 = vmatpush2.msra.mxu1 %v295_v55  ;;  %433 = vmatprep.subr.mxu0 %v164_v56  ;;  %v262_v29 = vld [vmem:[#allocation5 + $0x538] sm:$0xff] }
  0x7d   :  { %v160_v60 = vld [vmem:[#allocation5 + $0x208] sm:$0xff]  ;;  %504 = vmatprep.subr.mxu1 %v292_v57  ;;  %v159_v62 = vld [vmem:[#allocation5 + $0x200] sm:$0xff]  ;;  %434 = vmatpush2.msra.mxu0 %v163_v58  ;;  %v133_v30 = vld [vmem:[#allocation5 + $0x130] sm:$0xff] }
  0x7e   :  { %v288_v61 = vld [vmem:[#allocation5 + $0x608] sm:$0xff]  ;;  %505 = vmatpush2.msra.mxu1 %v291_v59  ;;  %v287_v0 = vld [vmem:[#allocation5 + $0x600] sm:$0xff]  ;;  %435 = vmatprep.subr.mxu0 %v160_v60  ;;  %v261_v31 = vld [vmem:[#allocation5 + $0x530] sm:$0xff] }
  0x7f   :  { %v1320_v63 = vld [vmem:[#allocation2 + $0x8] sm:$0xff]  ;;  %v1322_v1 = vld [vmem:[#allocation2] sm:$0xff]  ;;  %506 = vmatprep.subr.mxu1 %v288_v61  ;;  %436 = vmatpush2.msra.mxu0 %v159_v62  ;;  %v130_v32 = vld [vmem:[#allocation5 + $0x118] sm:$0xff] }
  0x80   :  { %437 = vmatprep.mubr.f32.mxu0 %v1320_v63  ;;  %507 = vmatpush2.msra.mxu1 %v287_v0  ;;  %v258_v33 = vld [vmem:[#allocation5 + $0x518] sm:$0xff]  ;;  %v129_v34 = vld [vmem:[#allocation5 + $0x110] sm:$0xff] }
  0x81   :  { %438 = vmatmul.mubr.f32.vlgmr.msra.gmra.mxu0 %v1322_v1  ;;  %508 = vmatprep.mubr.f32.mxu1 %v1324_v2  ;;  %v257_v35 = vld [vmem:[#allocation5 + $0x510] sm:$0xff]  ;;  %v126_v36 = vld [vmem:[#allocation5 + $0xf8] sm:$0xff] }
  0x82   :  { %515 = vmatprep.subr.mxu0 %v158_v3  ;;  %586 = vmatprep.subr.mxu1 %v286_v4  ;;  %v254_v37 = vld [vmem:[#allocation5 + $0x4f8] sm:$0xff]  ;;  %v125_v38 = vld [vmem:[#allocation5 + $0xf0] sm:$0xff] }
  0x83   :  { %509 = vmatmul.mubr.f32.vlgmr.msra.gmra.mxu1 %v1327_v5  ;;  %516 = vmatpush1.msra.mxu0 %v157_v6  ;;  %v253_v39 = vld [vmem:[#allocation5 + $0x4f0] sm:$0xff]  ;;  %v122_v40 = vld [vmem:[#allocation5 + $0xd8] sm:$0xff] }
  0x84   :  { %587 = vmatpush1.msra.mxu1 %v285_v7  ;;  %517 = vmatprep.subr.mxu0 %v154_v8  ;;  %v250_v41 = vld [vmem:[#allocation5 + $0x4d8] sm:$0xff]  ;;  %v121_v42 = vld [vmem:[#allocation5 + $0xd0] sm:$0xff] }
  0x85   :  { %588 = vmatprep.subr.mxu1 %v282_v9  ;;  %518 = vmatpush1.msra.mxu0 %v153_v10  ;;  %v249_v43 = vld [vmem:[#allocation5 + $0x4d0] sm:$0xff]  ;;  %v118_v44 = vld [vmem:[#allocation5 + $0xb8] sm:$0xff] }
  0x86   :  { %589 = vmatpush1.msra.mxu1 %v281_v11  ;;  %519 = vmatprep.subr.mxu0 %v150_v12  ;;  %v246_v45 = vld [vmem:[#allocation5 + $0x4b8] sm:$0xff]  ;;  %v117_v46 = vld [vmem:[#allocation5 + $0xb0] sm:$0xff] }
  0x87   :  { %590 = vmatprep.subr.mxu1 %v278_v13  ;;  %520 = vmatpush1.msra.mxu0 %v149_v14  ;;  %v245_v47 = vld [vmem:[#allocation5 + $0x4b0] sm:$0xff]  ;;  %v114_v48 = vld [vmem:[#allocation5 + $0x98] sm:$0xff] }
  0x88   :  { %591 = vmatpush1.msra.mxu1 %v277_v15  ;;  %521 = vmatprep.subr.mxu0 %v146_v16  ;;  %v242_v49 = vld [vmem:[#allocation5 + $0x498] sm:$0xff]  ;;  %v113_v50 = vld [vmem:[#allocation5 + $0x90] sm:$0xff] }
  0x89   :  { %592 = vmatprep.subr.mxu1 %v274_v17  ;;  %522 = vmatpush1.msra.mxu0 %v145_v18  ;;  %v241_v51 = vld [vmem:[#allocation5 + $0x490] sm:$0xff]  ;;  %v110_v52 = vld [vmem:[#allocation5 + $0x78] sm:$0xff] }
  0x8a   :  { %593 = vmatpush1.msra.mxu1 %v273_v19  ;;  %523 = vmatprep.subr.mxu0 %v142_v20  ;;  %v238_v53 = vld [vmem:[#allocation5 + $0x478] sm:$0xff]  ;;  %v109_v54 = vld [vmem:[#allocation5 + $0x70] sm:$0xff] }
  0x8b   :  { %594 = vmatprep.subr.mxu1 %v270_v21  ;;  %524 = vmatpush1.msra.mxu0 %v141_v22  ;;  %v237_v55 = vld [vmem:[#allocation5 + $0x470] sm:$0xff]  ;;  %v106_v56 = vld [vmem:[#allocation5 + $0x58] sm:$0xff] }
  0x8c   :  { %595 = vmatpush1.msra.mxu1 %v269_v23  ;;  %525 = vmatprep.subr.mxu0 %v138_v24  ;;  %v234_v57 = vld [vmem:[#allocation5 + $0x458] sm:$0xff]  ;;  %v105_v58 = vld [vmem:[#allocation5 + $0x50] sm:$0xff] }
  0x8d   :  { %596 = vmatprep.subr.mxu1 %v266_v25  ;;  %526 = vmatpush1.msra.mxu0 %v137_v26  ;;  %v233_v59 = vld [vmem:[#allocation5 + $0x450] sm:$0xff]  ;;  %v102_v60 = vld [vmem:[#allocation5 + $0x38] sm:$0xff] }
  0x8e   :  { %597 = vmatpush1.msra.mxu1 %v265_v27  ;;  %527 = vmatprep.subr.mxu0 %v134_v28  ;;  %v230_v61 = vld [vmem:[#allocation5 + $0x438] sm:$0xff]  ;;  %v101_v62 = vld [vmem:[#allocation5 + $0x30] sm:$0xff] }
  0x8f   :  { %598 = vmatprep.subr.mxu1 %v262_v29  ;;  %528 = vmatpush1.msra.mxu0 %v133_v30  ;;  %v229_v0 = vld [vmem:[#allocation5 + $0x430] sm:$0xff]  ;;  %v98_v3 = vld [vmem:[#allocation5 + $0x18] sm:$0xff] }
  0x90   :  { %599 = vmatpush1.msra.mxu1 %v261_v31  ;;  %529 = vmatprep.subr.mxu0 %v130_v32  ;;  %v226_v4 = vld [vmem:[#allocation5 + $0x418] sm:$0xff]  ;;  %v97_v6 = vld [vmem:[#allocation5 + $0x10] sm:$0xff] }
  0x91   :  { %600 = vmatprep.subr.mxu1 %v258_v33  ;;  %530 = vmatpush1.msra.mxu0 %v129_v34  ;;  %v225_v7 = vld [vmem:[#allocation5 + $0x410] sm:$0xff]  ;;  %v222_v8 = vld [vmem:[#allocation5 + $0x3f8] sm:$0xff] }
  0x92   :  { %601 = vmatpush1.msra.mxu1 %v257_v35  ;;  %531 = vmatprep.subr.mxu0 %v126_v36  ;;  %v350_v9 = vld [vmem:[#allocation5 + $0x7f8] sm:$0xff]  ;;  %v221_v10 = vld [vmem:[#allocation5 + $0x3f0] sm:$0xff] }
  0x93   :  { %602 = vmatprep.subr.mxu1 %v254_v37  ;;  %532 = vmatpush1.msra.mxu0 %v125_v38  ;;  %v349_v11 = vld [vmem:[#allocation5 + $0x7f0] sm:$0xff]  ;;  %v218_v12 = vld [vmem:[#allocation5 + $0x3d8] sm:$0xff] }
  0x94   :  { %603 = vmatpush1.msra.mxu1 %v253_v39  ;;  %533 = vmatprep.subr.mxu0 %v122_v40  ;;  %v346_v13 = vld [vmem:[#allocation5 + $0x7d8] sm:$0xff]  ;;  %v217_v14 = vld [vmem:[#allocation5 + $0x3d0] sm:$0xff] }
  0x95   :  { %604 = vmatprep.subr.mxu1 %v250_v41  ;;  %534 = vmatpush1.msra.mxu0 %v121_v42  ;;  %v345_v15 = vld [vmem:[#allocation5 + $0x7d0] sm:$0xff]  ;;  %v214_v16 = vld [vmem:[#allocation5 + $0x3b8] sm:$0xff] }
  0x96   :  { %605 = vmatpush1.msra.mxu1 %v249_v43  ;;  %535 = vmatprep.subr.mxu0 %v118_v44  ;;  %v342_v17 = vld [vmem:[#allocation5 + $0x7b8] sm:$0xff]  ;;  %v213_v18 = vld [vmem:[#allocation5 + $0x3b0] sm:$0xff] }
  0x97   :  { %606 = vmatprep.subr.mxu1 %v246_v45  ;;  %536 = vmatpush1.msra.mxu0 %v117_v46  ;;  %v341_v19 = vld [vmem:[#allocation5 + $0x7b0] sm:$0xff]  ;;  %v210_v20 = vld [vmem:[#allocation5 + $0x398] sm:$0xff] }
  0x98   :  { %607 = vmatpush1.msra.mxu1 %v245_v47  ;;  %537 = vmatprep.subr.mxu0 %v114_v48  ;;  %v338_v21 = vld [vmem:[#allocation5 + $0x798] sm:$0xff]  ;;  %v209_v22 = vld [vmem:[#allocation5 + $0x390] sm:$0xff] }
  0x99   :  { %608 = vmatprep.subr.mxu1 %v242_v49  ;;  %538 = vmatpush1.msra.mxu0 %v113_v50  ;;  %v337_v23 = vld [vmem:[#allocation5 + $0x790] sm:$0xff]  ;;  %v206_v24 = vld [vmem:[#allocation5 + $0x378] sm:$0xff] }
  0x9a   :  { %609 = vmatpush1.msra.mxu1 %v241_v51  ;;  %539 = vmatprep.subr.mxu0 %v110_v52  ;;  %v334_v25 = vld [vmem:[#allocation5 + $0x778] sm:$0xff]  ;;  %v205_v26 = vld [vmem:[#allocation5 + $0x370] sm:$0xff] }
  0x9b   :  { %610 = vmatprep.subr.mxu1 %v238_v53  ;;  %540 = vmatpush1.msra.mxu0 %v109_v54  ;;  %v333_v27 = vld [vmem:[#allocation5 + $0x770] sm:$0xff]  ;;  %v202_v28 = vld [vmem:[#allocation5 + $0x358] sm:$0xff] }
  0x9c   :  { %611 = vmatpush1.msra.mxu1 %v237_v55  ;;  %541 = vmatprep.subr.mxu0 %v106_v56  ;;  %v330_v29 = vld [vmem:[#allocation5 + $0x758] sm:$0xff]  ;;  %v201_v30 = vld [vmem:[#allocation5 + $0x350] sm:$0xff] }
  0x9d   :  { %612 = vmatprep.subr.mxu1 %v234_v57  ;;  %542 = vmatpush1.msra.mxu0 %v105_v58  ;;  %v329_v31 = vld [vmem:[#allocation5 + $0x750] sm:$0xff]  ;;  %v198_v32 = vld [vmem:[#allocation5 + $0x338] sm:$0xff] }
  0x9e   :  { %613 = vmatpush1.msra.mxu1 %v233_v59  ;;  %543 = vmatprep.subr.mxu0 %v102_v60  ;;  %v326_v33 = vld [vmem:[#allocation5 + $0x738] sm:$0xff]  ;;  %v197_v34 = vld [vmem:[#allocation5 + $0x330] sm:$0xff] }
  0x9f   :  { %614 = vmatprep.subr.mxu1 %v230_v61  ;;  %544 = vmatpush1.msra.mxu0 %v101_v62  ;;  %v325_v35 = vld [vmem:[#allocation5 + $0x730] sm:$0xff]  ;;  %v194_v36 = vld [vmem:[#allocation5 + $0x318] sm:$0xff] }
  0xa0   :  { %615 = vmatpush1.msra.mxu1 %v229_v0  ;;  %545 = vmatprep.subr.mxu0 %v98_v3  ;;  %v322_v37 = vld [vmem:[#allocation5 + $0x718] sm:$0xff]  ;;  %v193_v38 = vld [vmem:[#allocation5 + $0x310] sm:$0xff] }
  0xa1   :  { %616 = vmatprep.subr.mxu1 %v226_v4  ;;  %546 = vmatpush1.msra.mxu0 %v97_v6  ;;  %v321_v39 = vld [vmem:[#allocation5 + $0x710] sm:$0xff]  ;;  %v190_v40 = vld [vmem:[#allocation5 + $0x2f8] sm:$0xff] }
  0xa2   :  { %617 = vmatpush1.msra.mxu1 %v225_v7  ;;  %547 = vmatprep.subr.mxu0 %v222_v8  ;;  %v318_v41 = vld [vmem:[#allocation5 + $0x6f8] sm:$0xff]  ;;  %v189_v42 = vld [vmem:[#allocation5 + $0x2f0] sm:$0xff] }
  0xa3   :  { %618 = vmatprep.subr.mxu1 %v350_v9  ;;  %548 = vmatpush2.msra.mxu0 %v221_v10  ;;  %v317_v43 = vld [vmem:[#allocation5 + $0x6f0] sm:$0xff]  ;;  %v186_v44 = vld [vmem:[#allocation5 + $0x2d8] sm:$0xff] }
  0xa4   :  { %619 = vmatpush2.msra.mxu1 %v349_v11  ;;  %549 = vmatprep.subr.mxu0 %v218_v12  ;;  %v314_v45 = vld [vmem:[#allocation5 + $0x6d8] sm:$0xff]  ;;  %v185_v46 = vld [vmem:[#allocation5 + $0x2d0] sm:$0xff] }
  0xa5   :  { %620 = vmatprep.subr.mxu1 %v346_v13  ;;  %550 = vmatpush2.msra.mxu0 %v217_v14  ;;  %v313_v47 = vld [vmem:[#allocation5 + $0x6d0] sm:$0xff]  ;;  %v182_v48 = vld [vmem:[#allocation5 + $0x2b8] sm:$0xff] }
  0xa6   :  { %621 = vmatpush2.msra.mxu1 %v345_v15  ;;  %551 = vmatprep.subr.mxu0 %v214_v16  ;;  %v310_v49 = vld [vmem:[#allocation5 + $0x6b8] sm:$0xff]  ;;  %v181_v50 = vld [vmem:[#allocation5 + $0x2b0] sm:$0xff]  ;;  %v689_v15 = vld [vmem:[#allocation8 + $0xe0] sm:$0xff] }
  0xa7   :  { %622 = vmatprep.subr.mxu1 %v342_v17  ;;  %552 = vmatpush2.msra.mxu0 %v213_v18  ;;  %v309_v51 = vld [vmem:[#allocation5 + $0x6b0] sm:$0xff]  ;;  %v178_v52 = vld [vmem:[#allocation5 + $0x298] sm:$0xff] }
  0xa8   :  { %623 = vmatpush2.msra.mxu1 %v341_v19  ;;  %553 = vmatprep.subr.mxu0 %v210_v20  ;;  %v306_v53 = vld [vmem:[#allocation5 + $0x698] sm:$0xff]  ;;  %v177_v54 = vld [vmem:[#allocation5 + $0x290] sm:$0xff] }
  0xa9   :  { %624 = vmatprep.subr.mxu1 %v338_v21  ;;  %554 = vmatpush2.msra.mxu0 %v209_v22  ;;  %v305_v55 = vld [vmem:[#allocation5 + $0x690] sm:$0xff]  ;;  %v174_v56 = vld [vmem:[#allocation5 + $0x278] sm:$0xff]  ;;  %v753_v22 = vld [vmem:[#allocation8 + $0x2e0] sm:$0xff] }
  0xaa   :  { %625 = vmatpush2.msra.mxu1 %v337_v23  ;;  %555 = vmatprep.subr.mxu0 %v206_v24  ;;  %v302_v57 = vld [vmem:[#allocation5 + $0x678] sm:$0xff]  ;;  %v173_v58 = vld [vmem:[#allocation5 + $0x270] sm:$0xff]  ;;  %v681_v23 = vld [vmem:[#allocation8 + $0xa0] sm:$0xff] }
  0xab   :  { %626 = vmatprep.subr.mxu1 %v334_v25  ;;  %556 = vmatpush2.msra.mxu0 %v205_v26  ;;  %v301_v59 = vld [vmem:[#allocation5 + $0x670] sm:$0xff]  ;;  %v170_v60 = vld [vmem:[#allocation5 + $0x258] sm:$0xff] }
  0xac   :  { %627 = vmatpush2.msra.mxu1 %v333_v27  ;;  %557 = vmatprep.subr.mxu0 %v202_v28  ;;  %v298_v61 = vld [vmem:[#allocation5 + $0x658] sm:$0xff]  ;;  %v169_v62 = vld [vmem:[#allocation5 + $0x250] sm:$0xff] }
  0xad   :  { %628 = vmatprep.subr.mxu1 %v330_v29  ;;  %558 = vmatpush2.msra.mxu0 %v201_v30  ;;  %v297_v0 = vld [vmem:[#allocation5 + $0x650] sm:$0xff]  ;;  %v166_v3 = vld [vmem:[#allocation5 + $0x238] sm:$0xff]  ;;  %v749_v30 = vld [vmem:[#allocation8 + $0x2c0] sm:$0xff] }
  0xae   :  { %629 = vmatpush2.msra.mxu1 %v329_v31  ;;  %559 = vmatprep.subr.mxu0 %v198_v32  ;;  %v294_v4 = vld [vmem:[#allocation5 + $0x638] sm:$0xff]  ;;  %v165_v6 = vld [vmem:[#allocation5 + $0x230] sm:$0xff]  ;;  %v677_v31 = vld [vmem:[#allocation8 + $0x80] sm:$0xff] }
  0xaf   :  { %630 = vmatprep.subr.mxu1 %v326_v33  ;;  %560 = vmatpush2.msra.mxu0 %v197_v34  ;;  %v293_v7 = vld [vmem:[#allocation5 + $0x630] sm:$0xff]  ;;  %v162_v8 = vld [vmem:[#allocation5 + $0x218] sm:$0xff] }
  0xb0   :  { %631 = vmatpush2.msra.mxu1 %v325_v35  ;;  %561 = vmatprep.subr.mxu0 %v194_v36  ;;  %v290_v9 = vld [vmem:[#allocation5 + $0x618] sm:$0xff]  ;;  %v161_v10 = vld [vmem:[#allocation5 + $0x210] sm:$0xff] }
  0xb1   :  { %632 = vmatprep.subr.mxu1 %v322_v37  ;;  %562 = vmatpush2.msra.mxu0 %v193_v38  ;;  %v289_v11 = vld [vmem:[#allocation5 + $0x610] sm:$0xff]  ;;  %v692_v12 = vld [vmem:[#allocation8 + $0xf8] sm:$0xff]  ;;  %v745_v38 = vld [vmem:[#allocation8 + $0x2a0] sm:$0xff] }
  0xb2   :  { %633 = vmatpush2.msra.mxu1 %v321_v39  ;;  %563 = vmatprep.subr.mxu0 %v190_v40  ;;  %v691_v13 = vld [vmem:[#allocation8 + $0xf0] sm:$0xff]  ;;  %v690_v14 = vld [vmem:[#allocation8 + $0xe8] sm:$0xff]  ;;  %v688_v16 = vld [vmem:[#allocation8 + $0xd8] sm:$0xff] }
  0xb3   :  { %634 = vmatprep.subr.mxu1 %v318_v41  ;;  %564 = vmatpush2.msra.mxu0 %v189_v42  ;;  %v687_v17 = vld [vmem:[#allocation8 + $0xd0] sm:$0xff]  ;;  %v686_v18 = vld [vmem:[#allocation8 + $0xc8] sm:$0xff]  ;;  %v684_v19 = vld [vmem:[#allocation8 + $0xb8] sm:$0xff] }
  0xb4   :  { %635 = vmatpush2.msra.mxu1 %v317_v43  ;;  %565 = vmatprep.subr.mxu0 %v186_v44  ;;  %v683_v20 = vld [vmem:[#allocation8 + $0xb0] sm:$0xff]  ;;  %v752_v24 = vld [vmem:[#allocation8 + $0x2d8] sm:$0xff]  ;;  %v750_v28 = vld [vmem:[#allocation8 + $0x2c8] sm:$0xff] }
  0xb5   :  { %636 = vmatprep.subr.mxu1 %v314_v45  ;;  %566 = vmatpush2.msra.mxu0 %v185_v46  ;;  %v755_v21 = vld [vmem:[#allocation8 + $0x2f0] sm:$0xff]  ;;  %v680_v25 = vld [vmem:[#allocation8 + $0x98] sm:$0xff]  ;;  %v678_v29 = vld [vmem:[#allocation8 + $0x88] sm:$0xff] }
  0xb6   :  { %637 = vmatpush2.msra.mxu1 %v313_v47  ;;  %567 = vmatprep.subr.mxu0 %v182_v48  ;;  %v751_v26 = vld [vmem:[#allocation8 + $0x2d0] sm:$0xff]  ;;  %v748_v32 = vld [vmem:[#allocation8 + $0x2b8] sm:$0xff]  ;;  %v746_v36 = vld [vmem:[#allocation8 + $0x2a8] sm:$0xff] }
  0xb7   :  { %638 = vmatprep.subr.mxu1 %v310_v49  ;;  %568 = vmatpush2.msra.mxu0 %v181_v50  ;;  %v679_v27 = vld [vmem:[#allocation8 + $0x90] sm:$0xff]  ;;  %v676_v33 = vld [vmem:[#allocation8 + $0x78] sm:$0xff]  ;;  %v674_v37 = vld [vmem:[#allocation8 + $0x68] sm:$0xff] }
  0xb8   :  { %639 = vmatpush2.msra.mxu1 %v309_v51  ;;  %569 = vmatprep.subr.mxu0 %v178_v52  ;;  %v747_v34 = vld [vmem:[#allocation8 + $0x2b0] sm:$0xff]  ;;  %v673_v39 = vld [vmem:[#allocation8 + $0x60] sm:$0xff]  ;;  %v744_v40 = vld [vmem:[#allocation8 + $0x298] sm:$0xff] }
  0xb9   :  { %640 = vmatprep.subr.mxu1 %v306_v53  ;;  %570 = vmatpush2.msra.mxu0 %v177_v54  ;;  %v675_v35 = vld [vmem:[#allocation8 + $0x70] sm:$0xff]  ;;  %v672_v41 = vld [vmem:[#allocation8 + $0x58] sm:$0xff]  ;;  %v742_v44 = vld [vmem:[#allocation8 + $0x288] sm:$0xff] }
  0xba   :  { %641 = vmatpush2.msra.mxu1 %v305_v55  ;;  %571 = vmatprep.subr.mxu0 %v174_v56  ;;  %v743_v42 = vld [vmem:[#allocation8 + $0x290] sm:$0xff]  ;;  %v670_v45 = vld [vmem:[#allocation8 + $0x48] sm:$0xff]  ;;  %v741_v46 = vld [vmem:[#allocation8 + $0x280] sm:$0xff] }
  0xbb   :  { %642 = vmatprep.subr.mxu1 %v302_v57  ;;  %572 = vmatpush2.msra.mxu0 %v173_v58  ;;  %v671_v43 = vld [vmem:[#allocation8 + $0x50] sm:$0xff]  ;;  %v669_v47 = vld [vmem:[#allocation8 + $0x40] sm:$0xff]  ;;  %v740_v48 = vld [vmem:[#allocation8 + $0x278] sm:$0xff] }
  0xbc   :  { %643 = vmatpush2.msra.mxu1 %v301_v59  ;;  %573 = vmatprep.subr.mxu0 %v170_v60  ;;  %v668_v49 = vld [vmem:[#allocation8 + $0x38] sm:$0xff]  ;;  %v739_v50 = vld [vmem:[#allocation8 + $0x270] sm:$0xff]  ;;  %v738_v52 = vld [vmem:[#allocation8 + $0x268] sm:$0xff] }
  0xbd   :  { %644 = vmatprep.subr.mxu1 %v298_v61  ;;  %574 = vmatpush2.msra.mxu0 %v169_v62  ;;  %v667_v51 = vld [vmem:[#allocation8 + $0x30] sm:$0xff]  ;;  %v666_v53 = vld [vmem:[#allocation8 + $0x28] sm:$0xff]  ;;  %v737_v54 = vld [vmem:[#allocation8 + $0x260] sm:$0xff] }
  0xbe   :  { %645 = vmatpush2.msra.mxu1 %v297_v0  ;;  %575 = vmatprep.subr.mxu0 %v166_v3  ;;  %v665_v55 = vld [vmem:[#allocation8 + $0x20] sm:$0xff]  ;;  %v736_v56 = vld [vmem:[#allocation8 + $0x258] sm:$0xff]  ;;  %v735_v58 = vld [vmem:[#allocation8 + $0x250] sm:$0xff] }
  0xbf   :  { %646 = vmatprep.subr.mxu1 %v294_v4  ;;  %576 = vmatpush2.msra.mxu0 %v165_v6  ;;  %v664_v57 = vld [vmem:[#allocation8 + $0x18] sm:$0xff]  ;;  %v663_v59 = vld [vmem:[#allocation8 + $0x10] sm:$0xff]  ;;  %v734_v60 = vld [vmem:[#allocation8 + $0x248] sm:$0xff] }
  0xc0   :  { %647 = vmatpush2.msra.mxu1 %v293_v7  ;;  %577 = vmatprep.subr.mxu0 %v162_v8  ;;  %v662_v61 = vld [vmem:[#allocation8 + $0x8] sm:$0xff]  ;;  %v733_v62 = vld [vmem:[#allocation8 + $0x240] sm:$0xff]  ;;  %v732_v3 = vld [vmem:[#allocation8 + $0x238] sm:$0xff] }
  0xc1   :  { %648 = vmatprep.subr.mxu1 %v290_v9  ;;  %578 = vmatpush2.msra.mxu0 %v161_v10  ;;  %v661_v0 = vld [vmem:[#allocation8] sm:$0xff]  ;;  %v724_v4 = vld [vmem:[#allocation8 + $0x1f8] sm:$0xff]  ;;  %v731_v6 = vld [vmem:[#allocation8 + $0x230] sm:$0xff] }
  0xc2   :  { %579 = vmatprep.mubr.f32.mxu0 %v1320_v63  ;;  %649 = vmatpush2.msra.mxu1 %v289_v11  ;;  %v685_v63 = vld [vmem:[#allocation8 + $0xc0] sm:$0xff]  ;;  %v723_v7 = vld [vmem:[#allocation8 + $0x1f0] sm:$0xff]  ;;  %v730_v8 = vld [vmem:[#allocation8 + $0x228] sm:$0xff] }
  0xc3   :  { %650 = vmatprep.mubr.f32.mxu1 %v1324_v2  ;;  %580 = vmatmul.mubr.f32.vlgmr.msra.gmra.mxu0 %v1322_v1  ;;  %v756_v2 = vld [vmem:[#allocation8 + $0x2f8] sm:$0xff]  ;;  %v754_v1 = vld [vmem:[#allocation8 + $0x2e8] sm:$0xff]  ;;  %v729_v10 = vld [vmem:[#allocation8 + $0x220] sm:$0xff] }
  0xc4   :  { %651 = vmatmul.mubr.f32.vlgmr.msra.gmra.mxu1 %v1327_v5  ;;  %801 = vmatprep.subr.mxu0 %v692_v12  ;;  %v682_v5 = vld [vmem:[#allocation8 + $0xa8] sm:$0xff]  ;;  %v721_v11 = vld [vmem:[#allocation8 + $0x1e0] sm:$0xff]  ;;  %v728_v12 = vld [vmem:[#allocation8 + $0x218] sm:$0xff] }
  0xc5   :  { %802 = vmatpush1.msra.mxu0 %v691_v13  ;;  %872 = vmatprep.subr.mxu1 %v756_v2  ;;  %v722_v9 = vld [vmem:[#allocation8 + $0x1e8] sm:$0xff]  ;;  %v720_v13 = vld [vmem:[#allocation8 + $0x1d8] sm:$0xff]  ;;  %v787_v2 = vld [vmem:[#allocation8 + $0x3f0] sm:$0xff] }
  0xc6   :  { %803 = vmatprep.subr.mxu0 %v690_v14  ;;  %873 = vmatpush1.msra.mxu1 %v755_v21  ;;  %v727_v14 = vld [vmem:[#allocation8 + $0x210] sm:$0xff] }
  0xc7   :  { %804 = vmatpush1.msra.mxu0 %v689_v15  ;;  %874 = vmatprep.subr.mxu1 %v754_v1  ;;  %v719_v15 = vld [vmem:[#allocation8 + $0x1d0] sm:$0xff]  ;;  %v786_v1 = vld [vmem:[#allocation8 + $0x3e8] sm:$0xff] }
  0xc8   :  { %805 = vmatprep.subr.mxu0 %v688_v16  ;;  %875 = vmatpush1.msra.mxu1 %v753_v22  ;;  %v726_v16 = vld [vmem:[#allocation8 + $0x208] sm:$0xff]  ;;  %v715_v21 = vld [vmem:[#allocation8 + $0x1b0] sm:$0xff]  ;;  %v785_v22 = vld [vmem:[#allocation8 + $0x3e0] sm:$0xff] }
  0xc9   :  { %806 = vmatpush1.msra.mxu0 %v687_v17  ;;  %876 = vmatprep.subr.mxu1 %v752_v24  ;;  %v718_v17 = vld [vmem:[#allocation8 + $0x1c8] sm:$0xff]  ;;  %v784_v24 = vld [vmem:[#allocation8 + $0x3d8] sm:$0xff] }
  0xca   :  { %807 = vmatprep.subr.mxu0 %v686_v18  ;;  %877 = vmatpush1.msra.mxu1 %v751_v26  ;;  %v725_v18 = vld [vmem:[#allocation8 + $0x200] sm:$0xff]  ;;  %v783_v26 = vld [vmem:[#allocation8 + $0x3d0] sm:$0xff] }
  0xcb   :  { %808 = vmatpush1.msra.mxu0 %v685_v63  ;;  %878 = vmatprep.subr.mxu1 %v750_v28  ;;  %v717_v63 = vld [vmem:[#allocation8 + $0x1c0] sm:$0xff]  ;;  %v782_v28 = vld [vmem:[#allocation8 + $0x3c8] sm:$0xff] }
  0xcc   :  { %809 = vmatprep.subr.mxu0 %v684_v19  ;;  %879 = vmatpush1.msra.mxu1 %v749_v30  ;;  %v788_v19 = vld [vmem:[#allocation8 + $0x3f8] sm:$0xff]  ;;  %v781_v30 = vld [vmem:[#allocation8 + $0x3c0] sm:$0xff] }
  0xcd   :  { %810 = vmatpush1.msra.mxu0 %v683_v20  ;;  %880 = vmatprep.subr.mxu1 %v748_v32  ;;  %v716_v20 = vld [vmem:[#allocation8 + $0x1b8] sm:$0xff] }
  0xce   :  { %811 = vmatprep.subr.mxu0 %v682_v5  ;;  %881 = vmatpush1.msra.mxu1 %v747_v34  ;;  %v714_v5 = vld [vmem:[#allocation8 + $0x1a8] sm:$0xff]  ;;  %v780_v32 = vld [vmem:[#allocation8 + $0x3b8] sm:$0xff]  ;;  %v779_v34 = vld [vmem:[#allocation8 + $0x3b0] sm:$0xff] }
  0xcf   :  { %812 = vmatpush1.msra.mxu0 %v681_v23  ;;  %882 = vmatprep.subr.mxu1 %v746_v36  ;;  %v713_v23 = vld [vmem:[#allocation8 + $0x1a0] sm:$0xff]  ;;  %v778_v36 = vld [vmem:[#allocation8 + $0x3a8] sm:$0xff] }
  0xd0   :  { %813 = vmatprep.subr.mxu0 %v680_v25  ;;  %883 = vmatpush1.msra.mxu1 %v745_v38  ;;  %v712_v25 = vld [vmem:[#allocation8 + $0x198] sm:$0xff]  ;;  %v777_v38 = vld [vmem:[#allocation8 + $0x3a0] sm:$0xff] }
  0xd1   :  { %814 = vmatpush1.msra.mxu0 %v679_v27  ;;  %884 = vmatprep.subr.mxu1 %v744_v40  ;;  %v711_v27 = vld [vmem:[#allocation8 + $0x190] sm:$0xff]  ;;  %v776_v40 = vld [vmem:[#allocation8 + $0x398] sm:$0xff] }
  0xd2   :  { %815 = vmatprep.subr.mxu0 %v678_v29  ;;  %885 = vmatpush1.msra.mxu1 %v743_v42  ;;  %v710_v29 = vld [vmem:[#allocation8 + $0x188] sm:$0xff]  ;;  %v775_v42 = vld [vmem:[#allocation8 + $0x390] sm:$0xff] }
  0xd3   :  { %816 = vmatpush1.msra.mxu0 %v677_v31  ;;  %886 = vmatprep.subr.mxu1 %v742_v44  ;;  %v709_v31 = vld [vmem:[#allocation8 + $0x180] sm:$0xff]  ;;  %v774_v44 = vld [vmem:[#allocation8 + $0x388] sm:$0xff] }
  0xd4   :  { %817 = vmatprep.subr.mxu0 %v676_v33  ;;  %887 = vmatpush1.msra.mxu1 %v741_v46  ;;  %v708_v33 = vld [vmem:[#allocation8 + $0x178] sm:$0xff]  ;;  %v773_v46 = vld [vmem:[#allocation8 + $0x380] sm:$0xff] }
  0xd5   :  { %818 = vmatpush1.msra.mxu0 %v675_v35  ;;  %888 = vmatprep.subr.mxu1 %v740_v48  ;;  %v707_v35 = vld [vmem:[#allocation8 + $0x170] sm:$0xff]  ;;  %v772_v48 = vld [vmem:[#allocation8 + $0x378] sm:$0xff] }
  0xd6   :  { %819 = vmatprep.subr.mxu0 %v674_v37  ;;  %889 = vmatpush1.msra.mxu1 %v739_v50  ;;  %v706_v37 = vld [vmem:[#allocation8 + $0x168] sm:$0xff]  ;;  %v771_v50 = vld [vmem:[#allocation8 + $0x370] sm:$0xff] }
  0xd7   :  { %820 = vmatpush1.msra.mxu0 %v673_v39  ;;  %890 = vmatprep.subr.mxu1 %v738_v52  ;;  %v705_v39 = vld [vmem:[#allocation8 + $0x160] sm:$0xff]  ;;  %v770_v52 = vld [vmem:[#allocation8 + $0x368] sm:$0xff] }
  0xd8   :  { %821 = vmatprep.subr.mxu0 %v672_v41  ;;  %891 = vmatpush1.msra.mxu1 %v737_v54  ;;  %v704_v41 = vld [vmem:[#allocation8 + $0x158] sm:$0xff]  ;;  %v769_v54 = vld [vmem:[#allocation8 + $0x360] sm:$0xff] }
  0xd9   :  { %822 = vmatpush1.msra.mxu0 %v671_v43  ;;  %892 = vmatprep.subr.mxu1 %v736_v56  ;;  %v703_v43 = vld [vmem:[#allocation8 + $0x150] sm:$0xff]  ;;  %v768_v56 = vld [vmem:[#allocation8 + $0x358] sm:$0xff] }
  0xda   :  { %823 = vmatprep.subr.mxu0 %v670_v45  ;;  %893 = vmatpush1.msra.mxu1 %v735_v58  ;;  %v702_v45 = vld [vmem:[#allocation8 + $0x148] sm:$0xff]  ;;  %v767_v58 = vld [vmem:[#allocation8 + $0x350] sm:$0xff] }
  0xdb   :  { %824 = vmatpush1.msra.mxu0 %v669_v47  ;;  %894 = vmatprep.subr.mxu1 %v734_v60  ;;  %v701_v47 = vld [vmem:[#allocation8 + $0x140] sm:$0xff]  ;;  %v694_v60 = vld [vmem:[#allocation8 + $0x108] sm:$0xff] }
  0xdc   :  { %825 = vmatprep.subr.mxu0 %v668_v49  ;;  %895 = vmatpush1.msra.mxu1 %v733_v62  ;;  %v700_v49 = vld [vmem:[#allocation8 + $0x138] sm:$0xff]  ;;  %v766_v62 = vld [vmem:[#allocation8 + $0x348] sm:$0xff] }
  0xdd   :  { %826 = vmatpush1.msra.mxu0 %v667_v51  ;;  %896 = vmatprep.subr.mxu1 %v732_v3  ;;  %v699_v51 = vld [vmem:[#allocation8 + $0x130] sm:$0xff]  ;;  %v764_v3 = vld [vmem:[#allocation8 + $0x338] sm:$0xff] }
  0xde   :  { %827 = vmatprep.subr.mxu0 %v666_v53  ;;  %897 = vmatpush1.msra.mxu1 %v731_v6  ;;  %v698_v53 = vld [vmem:[#allocation8 + $0x128] sm:$0xff] }
  0xdf   :  { %828 = vmatpush1.msra.mxu0 %v665_v55  ;;  %898 = vmatprep.subr.mxu1 %v730_v8  ;;  %v697_v55 = vld [vmem:[#allocation8 + $0x120] sm:$0xff]  ;;  %v762_v6 = vld [vmem:[#allocation8 + $0x328] sm:$0xff]  ;;  %v760_v8 = vld [vmem:[#allocation8 + $0x318] sm:$0xff] }
  0xe0   :  { %829 = vmatprep.subr.mxu0 %v664_v57  ;;  %899 = vmatpush1.msra.mxu1 %v729_v10  ;;  %v696_v57 = vld [vmem:[#allocation8 + $0x118] sm:$0xff]  ;;  %v758_v10 = vld [vmem:[#allocation8 + $0x308] sm:$0xff] }
  0xe1   :  { %830 = vmatpush1.msra.mxu0 %v663_v59  ;;  %900 = vmatprep.subr.mxu1 %v728_v12  ;;  %v695_v59 = vld [vmem:[#allocation8 + $0x110] sm:$0xff]  ;;  %v353_v12 = vlaneseq }
  0xe2   :  { %831 = vmatprep.subr.mxu0 %v662_v61  ;;  %901 = vmatpush1.msra.mxu1 %v727_v14  ;;  %v693_v61 = vld [vmem:[#allocation8 + $0x100] sm:$0xff] }
  0xe3   :  { %832 = vmatpush1.msra.mxu0 %v661_v0  ;;  %902 = vmatprep.subr.mxu1 %v726_v16  ;;  %v765_v0 = vld [vmem:[#allocation8 + $0x340] sm:$0xff] }
  0xe4   :  { %833 = vmatprep.subr.mxu0 %v724_v4  ;;  %903 = vmatpush1.msra.mxu1 %v725_v18  ;;  %v763_v4 = vld [vmem:[#allocation8 + $0x330] sm:$0xff] }
  0xe5   :  { %834 = vmatpush2.msra.mxu0 %v723_v7  ;;  %904 = vmatprep.subr.mxu1 %v788_v19  ;;  %v761_v7 = vld [vmem:[#allocation8 + $0x320] sm:$0xff] }
  0xe6   :  { %835 = vmatprep.subr.mxu0 %v722_v9  ;;  %905 = vmatpush2.msra.mxu1 %v787_v2  ;;  %v759_v9 = vld [vmem:[#allocation8 + $0x310] sm:$0xff] }
  0xe7   :  { %836 = vmatpush2.msra.mxu0 %v721_v11  ;;  %906 = vmatprep.subr.mxu1 %v786_v1  ;;  %v757_v11 = vld [vmem:[#allocation8 + $0x300] sm:$0xff] }
  0xe8   :  { %837 = vmatprep.subr.mxu0 %v720_v13  ;;  %907 = vmatpush2.msra.mxu1 %v785_v22  ;;  %v354_v13 = vshrl.u32 %v353_v12, 7  ;;  %v1007_v12 = vld [vmem:[#allocation10 + $0x1f0] sm:$0xff] }
  0xe9   :  { %838 = vmatpush2.msra.mxu0 %v719_v15  ;;  %908 = vmatprep.subr.mxu1 %v784_v24  ;;  %v351_v15 = vld [vmem:[#allocation7] sm:$0xf] }
  0xea   :  { %839 = vmatprep.subr.mxu0 %v718_v17  ;;  %909 = vmatpush2.msra.mxu1 %v783_v26  ;;  %v1336_v14 = vsub.s32 0, %v354_v13  ;;  %v1338_v16 = vsub.s32 1, %v354_v13  ;;  %v367_v26 = vsub.s32 3, %v354_v13 }
  0xeb   :  { %840 = vmatpush2.msra.mxu0 %v717_v63  ;;  %910 = vmatprep.subr.mxu1 %v782_v28 }
  0xec   :  { %841 = vmatprep.subr.mxu0 %v716_v20  ;;  %911 = vmatpush2.msra.mxu1 %v781_v30  ;;  %v356_v17 = vrot.slane %v351_v15, %v1336_v14  ;;  %v360_v18 = vrot.slane %v351_v15, %v1338_v16  ;;  %v368_v28 = vrot.slane %v351_v15, %v367_v26  ;;  %v991_v26 = vld [vmem:[#allocation10 + $0x170] sm:$0xff] }
  0xed   :  { %842 = vmatpush2.msra.mxu0 %v715_v21  ;;  %912 = vmatprep.subr.mxu1 %v780_v32 }
  0xee   :  { %843 = vmatprep.subr.mxu0 %v714_v5  ;;  %913 = vmatpush2.msra.mxu1 %v779_v34 }
  0xef   :  { %844 = vmatpush2.msra.mxu0 %v713_v23  ;;  %914 = vmatprep.subr.mxu1 %v778_v36 }
  0xf0   :  { %845 = vmatprep.subr.mxu0 %v712_v25  ;;  %915 = vmatpush2.msra.mxu1 %v777_v38  ;;  %v363_v25 = vsub.s32 2, %v354_v13  ;;  %v1006_v13 = vld [vmem:[#allocation10 + $0x1e8] sm:$0xff] }
  0xf1   :  { %846 = vmatpush2.msra.mxu0 %v711_v27  ;;  %916 = vmatprep.subr.mxu1 %v776_v40  ;;  %v975_v40 = vld [vmem:[#allocation10 + $0xf0] sm:$0xff] }
  0xf2   :  { %847 = vmatprep.subr.mxu0 %v710_v29  ;;  %917 = vmatpush2.msra.mxu1 %v775_v42  ;;  %v364_v27 = vrot.slane %v351_v15, %v363_v25  ;;  %v973_v42 = vld [vmem:[#allocation10 + $0xe0] sm:$0xff]  ;;  %v992_v25 = vld [vmem:[#allocation10 + $0x178] sm:$0xff] }
  0xf3   :  { %848 = vmatpush2.msra.mxu0 %v709_v31  ;;  %918 = vmatprep.subr.mxu1 %v774_v44  ;;  %v971_v44 = vld [vmem:[#allocation10 + $0xd0] sm:$0xff]  ;;  %v1005_v15 = vld [vmem:[#allocation10 + $0x1e0] sm:$0xff] }
  0xf4   :  { %849 = vmatprep.subr.mxu0 %v708_v33  ;;  %919 = vmatpush2.msra.mxu1 %v773_v46  ;;  %v969_v46 = vld [vmem:[#allocation10 + $0xc0] sm:$0xff] }
  0xf5   :  { %850 = vmatpush2.msra.mxu0 %v707_v35  ;;  %920 = vmatprep.subr.mxu1 %v772_v48  ;;  %v967_v48 = vld [vmem:[#allocation10 + $0xb0] sm:$0xff] }
  0xf6   :  { %851 = vmatprep.subr.mxu0 %v706_v37  ;;  %921 = vmatpush2.msra.mxu1 %v771_v50  ;;  %v965_v50 = vld [vmem:[#allocation10 + $0xa0] sm:$0xff] }
  0xf7   :  { %852 = vmatpush2.msra.mxu0 %v705_v39  ;;  %922 = vmatprep.subr.mxu1 %v770_v52  ;;  %v976_v39 = vld [vmem:[#allocation10 + $0xf8] sm:$0xff]  ;;  %v963_v52 = vld [vmem:[#allocation10 + $0x90] sm:$0xff] }
  0xf8   :  { %853 = vmatprep.subr.mxu0 %v704_v41  ;;  %923 = vmatpush2.msra.mxu1 %v769_v54  ;;  %v974_v41 = vld [vmem:[#allocation10 + $0xe8] sm:$0xff]  ;;  %v961_v54 = vld [vmem:[#allocation10 + $0x80] sm:$0xff] }
  0xf9   :  { %854 = vmatpush2.msra.mxu0 %v703_v43  ;;  %924 = vmatprep.subr.mxu1 %v768_v56  ;;  %v972_v43 = vld [vmem:[#allocation10 + $0xd8] sm:$0xff]  ;;  %v959_v56 = vld [vmem:[#allocation10 + $0x70] sm:$0xff] }
  0xfa   :  { %855 = vmatprep.subr.mxu0 %v702_v45  ;;  %925 = vmatpush2.msra.mxu1 %v767_v58  ;;  %v970_v45 = vld [vmem:[#allocation10 + $0xc8] sm:$0xff]  ;;  %v957_v58 = vld [vmem:[#allocation10 + $0x60] sm:$0xff] }
  0xfb   :  { %856 = vmatpush2.msra.mxu0 %v701_v47  ;;  %926 = vmatprep.subr.mxu1 %v766_v62  ;;  %v968_v47 = vld [vmem:[#allocation10 + $0xb8] sm:$0xff]  ;;  %v953_v62 = vld [vmem:[#allocation10 + $0x40] sm:$0xff] }
  0xfc   :  { %857 = vmatprep.subr.mxu0 %v700_v49  ;;  %927 = vmatpush2.msra.mxu1 %v765_v0  ;;  %v966_v49 = vld [vmem:[#allocation10 + $0xa8] sm:$0xff]  ;;  %v952_v0 = vld [vmem:[#allocation10 + $0x38] sm:$0xff] }
  0xfd   :  { %858 = vmatpush2.msra.mxu0 %v699_v51  ;;  %928 = vmatprep.subr.mxu1 %v764_v3  ;;  %v964_v51 = vld [vmem:[#allocation10 + $0x98] sm:$0xff]  ;;  %v951_v3 = vld [vmem:[#allocation10 + $0x30] sm:$0xff] }
  0xfe   :  { %859 = vmatprep.subr.mxu0 %v698_v53  ;;  %929 = vmatpush2.msra.mxu1 %v763_v4  ;;  %v962_v53 = vld [vmem:[#allocation10 + $0x88] sm:$0xff] }
  0xff   :  { %860 = vmatpush2.msra.mxu0 %v697_v55  ;;  %930 = vmatprep.subr.mxu1 %v762_v6  ;;  %v960_v55 = vld [vmem:[#allocation10 + $0x78] sm:$0xff]  ;;  %v950_v4 = vld [vmem:[#allocation10 + $0x28] sm:$0xff]  ;;  %v949_v6 = vld [vmem:[#allocation10 + $0x20] sm:$0xff] }
 0x100   :  { %861 = vmatprep.subr.mxu0 %v696_v57  ;;  %931 = vmatpush2.msra.mxu1 %v761_v7  ;;  %v958_v57 = vld [vmem:[#allocation10 + $0x68] sm:$0xff]  ;;  %v948_v7 = vld [vmem:[#allocation10 + $0x18] sm:$0xff] }
 0x101   :  { %862 = vmatpush2.msra.mxu0 %v695_v59  ;;  %932 = vmatprep.subr.mxu1 %v760_v8  ;;  %v956_v59 = vld [vmem:[#allocation10 + $0x58] sm:$0xff]  ;;  %v947_v8 = vld [vmem:[#allocation10 + $0x10] sm:$0xff] }
 0x102   :  { %863 = vmatprep.subr.mxu0 %v694_v60  ;;  %933 = vmatpush2.msra.mxu1 %v759_v9  ;;  %v955_v60 = vld [vmem:[#allocation10 + $0x50] sm:$0xff]  ;;  %v946_v9 = vld [vmem:[#allocation10 + $0x8] sm:$0xff] }
 0x103   :  { %864 = vmatpush2.msra.mxu0 %v693_v61  ;;  %934 = vmatprep.subr.mxu1 %v758_v10  ;;  %v954_v61 = vld [vmem:[#allocation10 + $0x48] sm:$0xff]  ;;  %v945_v10 = vld [vmem:[#allocation10] sm:$0xff] }
 0x104   :  { %935 = vmatpush2.msra.mxu1 %v757_v11  ;;  %1021 = vmatprep.subr.mxu0 %v976_v39  ;;  %v1008_v11 = vld [vmem:[#allocation10 + $0x1f8] sm:$0xff]  ;;  %v978_v39 = vld [vmem:[#allocation10 + $0x108] sm:$0xff] }
 0x141   :  { %v439_v63 = vpop.f32.mrf.mxu0 }
 0x142   :  { %v440_v19 = vadd.f32 %v439_v63, %v356_v17  ;;  %v1004_v17 = vld [vmem:[#allocation10 + $0x1d8] sm:$0xff]  ;;  %v1002_v63 = vld [vmem:[#allocation10 + $0x1c8] sm:$0xff] }
 0x143   :  { %v510_v20 = vpop.f32.mrf.mxu1  ;;  %v441_v2 = vpop.f32.mrf.mxu0 }
 0x144   :  { %v442_v21 = vadd.f32 %v441_v2, %v360_v18  ;;  %v511_v1 = vadd.f32 %v510_v20, %v440_v19  ;;  %v1003_v18 = vld [vmem:[#allocation10 + $0x1d0] sm:$0xff]  ;;  %v1001_v19 = vld [vmem:[#allocation10 + $0x1c0] sm:$0xff]  ;;  %v1000_v20 = vld [vmem:[#allocation10 + $0x1b8] sm:$0xff] }
 0x145   :  { %v512_v5 = vpop.f32.mrf.mxu1  ;;  %v999_v2 = vld [vmem:[#allocation10 + $0x1b0] sm:$0xff] }
 0x146   :  { %v513_v22 = vadd.f32 %v512_v5, %v442_v21  ;;  %v657_v24 = vmax.f32 %v511_v1, 0.0  ;;  %v998_v21 = vld [vmem:[#allocation10 + $0x1a8] sm:$0xff]  ;;  %v997_v1 = vld [vmem:[#allocation10 + $0x1a0] sm:$0xff]  ;;  %v996_v5 = vld [vmem:[#allocation10 + $0x198] sm:$0xff] }
 0x148   :  { %v658_v23 = vmax.f32 %v513_v22, 0.0  ;;  %v995_v22 = vld [vmem:[#allocation10 + $0x190] sm:$0xff] }
 0x14a   :  { %865 = vmatprep.mubr.f32.mxu0 %v658_v23  ;;  %v994_v23 = vld [vmem:[#allocation10 + $0x188] sm:$0xff] }
 0x14b   :  { %866 = vmatmul.mubr.f32.vlgmr.msra.gmra.mxu0 %v657_v24  ;;  %v993_v24 = vld [vmem:[#allocation10 + $0x180] sm:$0xff] }
 0x14c   :  { %1022 = vmatpush1.msra.mxu0 %v975_v40  ;;  %v977_v40 = vld [vmem:[#allocation10 + $0x100] sm:$0xff] }
 0x14d   :  { %1023 = vmatprep.subr.mxu0 %v974_v41  ;;  %v789_v41 = vld [vmem:[%s1359_s4] sm:$0x3]  ;;  %s1258_s4 = smov [#allocation11]  }
 0x14e   :  { %1024 = vmatpush1.msra.mxu0 %v973_v42  ;;  %s1100_s29 = sshll.u32 %s1258_s4, 4  ;;  %s1101_s29 = int_to_ptr.vmem [resolvable:$true] %s1100_s29 }
 0x14f   :  { %1025 = vmatprep.subr.mxu0 %v972_v43  ;;  %v794_v43 = vrot.slane %v789_v41, %v1336_v14  ;;  %s1221_s30 = scalar_lea.vmem %s1101_s29, 256  ;;  %p1226_p12 = scmp.lt.s32.totalorder %s1101_s29, %s1101_s29 }
 0x150   :  { %1026 = vmatpush1.msra.mxu0 %v971_v44  ;;  %v798_v44 = vrot.slane %v789_v41, %v1338_v16  ;;  %p1222_p11 = scmp.ne.s32.totalorder %s1101_s29, %s1221_s30  ;;  %p1227_p13 = scmp.lt.s32.totalorder %s1221_s30, %s1221_s30 }
 0x151   :  { %1027 = vmatprep.subr.mxu0 %v970_v45 }
 0x152   :  { %1028 = vmatpush1.msra.mxu0 %v969_v46  ;;  %p1228_p0 = por %p1227_p13, %p1226_p12 }
 0x153   :  { %1029 = vmatprep.subr.mxu0 %v968_v47 }
 0x154   :  { %1030 = vmatpush1.msra.mxu0 %v967_v48  ;;  %p1229_p1 = pnand %p1228_p0, %p1222_p11 }
 0x155   :  { %1031 = vmatprep.subr.mxu0 %v966_v49 }
 0x156   :  { %1032 = vmatpush1.msra.mxu0 %v965_v50 }
 0x157   :  { %1033 = vmatprep.subr.mxu0 %v964_v51 }
 0x158   :  { %1034 = vmatpush1.msra.mxu0 %v963_v52 }
 0x159   :  { %1035 = vmatprep.subr.mxu0 %v962_v53 }
 0x15a   :  { %1036 = vmatpush1.msra.mxu0 %v961_v54  ;;  %v1009_v54 = vld [vmem:[%s1361_s6] sm:$0x3] }
 0x15b   :  { %1037 = vmatprep.subr.mxu0 %v960_v55  ;;  %v1014_v55 = vrot.slane %v1009_v54, %v1336_v14 }
 0x15c   :  { %1038 = vmatpush1.msra.mxu0 %v959_v56  ;;  %v1018_v56 = vrot.slane %v1009_v54, %v1338_v16 }
 0x15d   :  { %1039 = vmatprep.subr.mxu0 %v958_v57 }
 0x15e   :  { %1040 = vmatpush1.msra.mxu0 %v957_v58 }
 0x15f   :  { %1041 = vmatprep.subr.mxu0 %v956_v59 }
 0x160   :  { %1042 = vmatpush1.msra.mxu0 %v955_v60 }
 0x161   :  { %1043 = vmatprep.subr.mxu0 %v954_v61 }
 0x162   :  { %1044 = vmatpush1.msra.mxu0 %v953_v62 }
 0x163   :  { %1045 = vmatprep.subr.mxu0 %v952_v0 }
 0x164   :  { %1046 = vmatpush1.msra.mxu0 %v951_v3 }
 0x165   :  { %1047 = vmatprep.subr.mxu0 %v950_v4 }
 0x166   :  { %1048 = vmatpush1.msra.mxu0 %v949_v6 }
 0x167   :  { %1049 = vmatprep.subr.mxu0 %v948_v7 }
 0x168   :  { %1050 = vmatpush1.msra.mxu0 %v947_v8 }
 0x169   :  { %1051 = vmatprep.subr.mxu0 %v946_v9 }
 0x16a   :  { %1052 = vmatpush1.msra.mxu0 %v945_v10 }
 0x16b   :  { %1053 = vmatprep.subr.mxu0 %v1008_v11 }
 0x16c   :  { %1054 = vmatpush2.msra.mxu0 %v1007_v12 }
 0x16d   :  { %1055 = vmatprep.subr.mxu0 %v1006_v13 }
 0x16e   :  { %1056 = vmatpush2.msra.mxu0 %v1005_v15 }
 0x16f   :  { %1057 = vmatprep.subr.mxu0 %v1004_v17 }
 0x170   :  { %1058 = vmatpush2.msra.mxu0 %v1003_v18 }
 0x171   :  { %1059 = vmatprep.subr.mxu0 %v1002_v63 }
 0x172   :  { %1060 = vmatpush2.msra.mxu0 %v1001_v19 }
 0x173   :  { %1061 = vmatprep.subr.mxu0 %v1000_v20 }
 0x174   :  { %1062 = vmatpush2.msra.mxu0 %v999_v2 }
 0x175   :  { %1063 = vmatprep.subr.mxu0 %v998_v21 }
 0x176   :  { %1064 = vmatpush2.msra.mxu0 %v997_v1 }
 0x177   :  { %1065 = vmatprep.subr.mxu0 %v996_v5 }
 0x178   :  { %1066 = vmatpush2.msra.mxu0 %v995_v22 }
 0x179   :  { %1067 = vmatprep.subr.mxu0 %v994_v23 }
 0x17a   :  { %1068 = vmatpush2.msra.mxu0 %v993_v24 }
 0x17b   :  { %1069 = vmatprep.subr.mxu0 %v992_v25 }
 0x17c   :  { %1070 = vmatpush2.msra.mxu0 %v991_v26 }
 0x183   :  { %v581_v29 = vpop.f32.mrf.mxu0 }
 0x184   :  { %v652_v30 = vpop.f32.mrf.mxu1  ;;  %v582_v31 = vadd.f32 %v581_v29, %v364_v27  ;;  %v990_v27 = vld [vmem:[#allocation10 + $0x168] sm:$0xff]  ;;  %v988_v29 = vld [vmem:[#allocation10 + $0x158] sm:$0xff] }
 0x185   :  { %v583_v32 = vpop.f32.mrf.mxu0  ;;  %1071 = vmatprep.subr.mxu0 %v990_v27 }
 0x186   :  { %v584_v33 = vadd.f32 %v583_v32, %v368_v28  ;;  %v653_v34 = vadd.f32 %v652_v30, %v582_v31  ;;  %v654_v35 = vpop.f32.mrf.mxu1  ;;  %v989_v28 = vld [vmem:[#allocation10 + $0x160] sm:$0xff]  ;;  %v987_v30 = vld [vmem:[#allocation10 + $0x150] sm:$0xff]  ;;  %v986_v31 = vld [vmem:[#allocation10 + $0x148] sm:$0xff] }
 0x187   :  { %1072 = vmatpush2.msra.mxu0 %v989_v28  ;;  %v985_v32 = vld [vmem:[#allocation10 + $0x140] sm:$0xff] }
 0x188   :  { %v655_v36 = vadd.f32 %v654_v35, %v584_v33  ;;  %v659_v38 = vmax.f32 %v653_v34, 0.0  ;;  %1073 = vmatprep.subr.mxu0 %v988_v29  ;;  %v984_v33 = vld [vmem:[#allocation10 + $0x138] sm:$0xff]  ;;  %v983_v34 = vld [vmem:[#allocation10 + $0x130] sm:$0xff]  ;;  %v982_v35 = vld [vmem:[#allocation10 + $0x128] sm:$0xff] }
 0x189   :  { %1074 = vmatpush2.msra.mxu0 %v987_v30 }
 0x18a   :  { %v660_v37 = vmax.f32 %v655_v36, 0.0  ;;  %1075 = vmatprep.subr.mxu0 %v986_v31  ;;  %v981_v36 = vld [vmem:[#allocation10 + $0x120] sm:$0xff] }
 0x18b   :  { %1076 = vmatpush2.msra.mxu0 %v985_v32 }
 0x18c   :  { %936 = vmatprep.mubr.f32.mxu1 %v660_v37  ;;  %1077 = vmatprep.subr.mxu0 %v984_v33  ;;  %v980_v37 = vld [vmem:[#allocation10 + $0x118] sm:$0xff] }
 0x18d   :  { %937 = vmatmul.mubr.f32.vlgmr.msra.gmra.mxu1 %v659_v38  ;;  %1078 = vmatpush2.msra.mxu0 %v983_v34  ;;  %v979_v38 = vld [vmem:[#allocation10 + $0x110] sm:$0xff] }
 0x18e   :  { %1079 = vmatprep.subr.mxu0 %v982_v35 }
 0x18f   :  { %1080 = vmatpush2.msra.mxu0 %v981_v36 }
 0x190   :  { %1081 = vmatprep.subr.mxu0 %v980_v37 }
 0x191   :  { %1082 = vmatpush2.msra.mxu0 %v979_v38 }
 0x192   :  { %1083 = vmatprep.subr.mxu0 %v978_v39 }
 0x193   :  { %1084 = vmatpush2.msra.mxu0 %v977_v40 }
 0x20b   :  { %v867_v42 = vpop.f32.mrf.mxu0 }
 0x20c   :  { %v868_v46 = vadd.f32 %v867_v42, %v794_v43 }
 0x20d   :  { %v869_v45 = vpop.f32.mrf.mxu0 }
 0x20e   :  { %v870_v48 = vadd.f32 %v869_v45, %v798_v44 }
 0x24d   :  { %v938_v47 = vpop.f32.mrf.mxu1 }
 0x24e   :  { %v939_v49 = vadd.f32 %v938_v47, %v868_v46 }
 0x24f   :  { %v940_v50 = vpop.f32.mrf.mxu1 }
 0x250   :  { %v941_v51 = vadd.f32 %v940_v50, %v870_v48  ;;  %v943_v53 = vmax.f32 %v939_v49, 0.0 }
 0x252   :  { %v944_v52 = vmax.f32 %v941_v51, 0.0 }
 0x254   :  { %1085 = vmatprep.mubr.f32.mxu0 %v944_v52 }
 0x255   :  { %1086 = vmatmul.mubr.f32.vlgmr.msra.gmra.mxu0 %v943_v53 }
 0x315   :  { %v1087_v57 = vpop.f32.mrf.mxu0 }
 0x316   :  { %v1088_v58 = vadd.f32 %v1087_v57, %v1014_v55 }
 0x317   :  { %v1089_v59 = vpop.f32.mrf.mxu0 }
 0x318   :  { %1092 = vst [vmem:[#allocation11] sm:$0xff] %v1088_v58  ;;  %v1090_v60 = vadd.f32 %v1089_v59, %v1018_v56 }
 0x31a   :  { %1093 = vst [vmem:[#allocation11 + $0x8] sm:$0xff] %v1090_v60 }
 0x31b   :  { %1232 = shalt.err (!%p1229_p1)
}
 0x31c   :  { %1103 = dma.vmem_to_hbm [thread:$0]  %s1101_s29, 256, %s1362_s7, [#allocation4]  }
 0x31d   :  { %1247 = dma.done.wait [#allocation4], 256  }
 0x31e   :  { %1248 = vsyncadd [#allocation4], 4294967040 }
 0x31f   :  { %1107 = vsyncpa [#allocation3], 1 }
 0x320   :  { %1108 = vsyncpa [#allocation6], 1 }
 0x321   :  { %1109 = vsyncpa [#allocation9], 1 }
 0x322   :  { %1110 = vsyncpa [#allocation4], 1 }

</bundles_post_ra>
